<compile_context>
chip_gen: v5e
topology: v5e:2x2
jax: 0.10.0
libtpu: 0.0.40
codegen_flags: <defaults>
</compile_context>

<pallas_src>
import jax
import jax.numpy as jnp
from jax import lax
from jax.experimental import pallas as pl
from jax.experimental.pallas import tpu as pltpu


# ---------------------------------------------------------------------------
# Fused Pallas kernel: all three gates + weighted combine, one pass over x.
# x arrives flattened as (Bt, C, H*W) so the lane axis is H*W (lane-dense).
# ---------------------------------------------------------------------------
def _triplet_kernel(scal_ref, x_ref, a_cw_mx_ref, a_cw_mn_ref,
                    a_hc_mx_ref, a_hc_mn_ref,
                    p_sw_ref, p_bw_ref, p_sh_ref, p_bh_ref, o_ref):
    # scal_ref (SMEM, (16,)): [bias_hw, bias_cw, bias_hc, w1, w2, w3,
    #                          hw_max_taps(5), hw_mean_taps(5)]
    bt, C, HW = x_ref.shape
    W = p_sw_ref.shape[1]
    H = p_sh_ref.shape[1]

    # Loop-invariant matrix loads (re-used for every batch element in the block).
    a_cw_mx = a_cw_mx_ref[...]          # (C, C)   cw conv band, max half
    a_cw_mn = a_cw_mn_ref[...]          # (C, C)   cw conv band, mean half (1/H folded)
    a_hc_mx = a_hc_mx_ref[...]          # (H, H)   hc conv band (transposed), max half
    a_hc_mn = a_hc_mn_ref[...]          # (H, H)   hc conv band (transposed), mean half
    p_sw = p_sw_ref[...]                # (HW, W)  sum-over-H matrix
    p_bw = p_bw_ref[...]                # (W, HW)  broadcast (c,w) gate over h
    p_sh = p_sh_ref[...]                # (HW, H)  sum-over-W matrix
    p_bh = p_bh_ref[...]                # (H, HW)  broadcast (c,h) gate over w

    bias_hw = scal_ref[0]
    bias_cw = scal_ref[1]
    bias_hc = scal_ref[2]
    w1 = scal_ref[3]
    w2 = scal_ref[4]
    w3 = scal_ref[5]

    def sigmoid(y):
        # exp and the reciprocal both land on the (otherwise idle) EUP slot.
        return pl.reciprocal(1.0 + jnp.exp(-y), approx=False)

    def shift_h(v, d):
        # v: (1, HW) flat over (H, W).  Returns v shifted by d rows of W lanes
        # with zero fill == the zero-padded (5,1) conv tap at offset d.
        if d == 0:
            return v
        if d > 0:
            pad = jnp.zeros((1, d * W), jnp.float32)
            return jnp.concatenate([v[:, d * W:], pad], axis=1)
        pad = jnp.zeros((1, -d * W), jnp.float32)
        return jnp.concatenate([pad, v[:, :d * W]], axis=1)

    def one_batch(b, carry):
        x2 = x_ref[b].astype(jnp.float32)                       # (C, HW) lane-dense

        # ---- hw branch: ZPool over C; conv over H as 5 shifted FMAs ----------
        zmax_hw = jnp.max(x2, axis=0, keepdims=True)            # (1, HW)
        zsum_hw = jnp.sum(x2, axis=0, keepdims=True)            # (1, HW)
        y_hw = jnp.zeros((1, HW), jnp.float32)
        for k in range(5):
            d = k - 2
            y_hw = (y_hw + scal_ref[6 + k] * shift_h(zmax_hw, d)
                    + scal_ref[11 + k] * shift_h(zsum_hw, d))
        s_hw = sigmoid(y_hw + bias_hw)                          # (1, HW)

        # ---- cw / hc ZPool maxes in one pass of static lane slices -----------
        sl0 = x2[:, 0:W]
        zmax_cw = sl0                                           # (C, W) running max over h
        hc_cols = [jnp.max(sl0, axis=1, keepdims=True)]         # per-row max over w
        for h in range(1, H):
            sl = x2[:, h * W:(h + 1) * W]
            zmax_cw = jnp.maximum(zmax_cw, sl)
            hc_cols.append(jnp.max(sl, axis=1, keepdims=True))
        zmax_hc = jnp.concatenate(hc_cols, axis=1)              # (C, H)

        # ---- ZPool sums ride the idle MXU -------------------------------------
        zsum_cw = jnp.dot(x2, p_sw, preferred_element_type=jnp.float32)   # (C, W)
        zsum_hc = jnp.dot(x2, p_sh, preferred_element_type=jnp.float32)   # (C, H)

        # ---- cw branch: conv over C (banded matmul; O(C^2) is fine at small C,
        #      for C >= ~256 this should become 5 sublane-shifted FMAs) ---------
        y_cw = (jnp.dot(a_cw_mx, zmax_cw, preferred_element_type=jnp.float32)
                + jnp.dot(a_cw_mn, zsum_cw, preferred_element_type=jnp.float32))
        s_cw = sigmoid(y_cw + bias_cw)                          # (C, W)

        # ---- hc branch: conv over H (banded matmul on the right) --------------
        y_hc = (jnp.dot(zmax_hc, a_hc_mx, preferred_element_type=jnp.float32)
                + jnp.dot(zsum_hc, a_hc_mn, preferred_element_type=jnp.float32))
        s_hc = sigmoid(y_hc + bias_hc)                          # (C, H)

        # ---- combine: MXU replication back to (C, HW); one FMA; dense store ---
        gate = (w1 * s_hw                                        # broadcast over C
                + jnp.dot(w2 * s_cw, p_bw, preferred_element_type=jnp.float32)
                + jnp.dot(w3 * s_hc, p_bh, preferred_element_type=jnp.float32))
        o_ref[b] = (x2 * gate).astype(o_ref.dtype)
        return carry

    lax.fori_loop(0, bt, one_batch, 0, unroll=True)


# ---------------------------------------------------------------------------
# Parameter folding / glue (plain JAX, tiny matrices only)
# ---------------------------------------------------------------------------
def _band(taps, L):
    """(L, L) matrix with A[i, j] = taps[j - i + 2], i.e. (A @ z)[i] = sum_k taps[k] z[i+k-2]."""
    A = jnp.zeros((L, L), jnp.float32)
    for k in range(5):
        A = A + taps[k] * jnp.eye(L, k=k - 2, dtype=jnp.float32)
    return A


def _bn_fold(bn):
    gamma, beta, r_mean, r_var, eps = bn
    scale = gamma / jnp.sqrt(r_var + eps)
    return scale, beta - r_mean * scale


def init_params(key):
    ks = jax.random.split(key, 3)
    bound = 1.0 / jnp.sqrt(2.0 * 5.0 * 1.0)   # kaiming_uniform(a=sqrt(5)) bound

    def conv_init(k):
        return jax.random.uniform(k, (1, 2, 5, 1), jnp.float32, -bound, bound)

    # eval-mode BatchNorm2d(1) with default params: gamma=1, beta=0, mean=0, var=1
    # TODO(synk): PyTorch training-mode BN (batch statistics) is not reproduced;
    # eval-mode BN with default running stats is used instead.
    bn = (jnp.float32(1.0), jnp.float32(0.0), jnp.float32(0.0),
          jnp.float32(1.0), jnp.float32(1e-5))
    return {
        "cw_w": conv_init(ks[0]), "cw_bn": bn,
        "hc_w": conv_init(ks[1]), "hc_bn": bn,
        "hw_w": conv_init(ks[2]), "hw_bn": bn,
        "w123": jnp.array([1.0 / 3, 1.0 / 3, 1.0 / 3], jnp.float32),
    }


def triplet_attention(x, params):
    B, C, H, W = x.shape
    HW = H * W
    x_flat = x.reshape(B, C, HW)   # free: contiguous NCHW -> lane-dense last dim

    # --- fold Conv2d(2,1,(5,1),pad=(2,0)) + eval BatchNorm per branch -------------
    sc_hw, b_hw = _bn_fold(params["hw_bn"])
    sc_cw, b_cw = _bn_fold(params["cw_bn"])
    sc_hc, b_hc = _bn_fold(params["hc_bn"])

    # hw: reduce over C (mean 1/C folded), conv over H -> 5 + 5 scalar taps.
    t_hw_max = sc_hw * params["hw_w"][0, 0, :, 0]
    t_hw_mean = (sc_hw / C) * params["hw_w"][0, 1, :, 0]
    # cw: reduce over H (mean 1/H folded), conv over C -> (C, C) bands, left-multiplied.
    a_cw_mx = sc_cw * _band(params["cw_w"][0, 0, :, 0], C)
    a_cw_mn = (sc_cw / H) * _band(params["cw_w"][0, 1, :, 0], C)
    # hc: reduce over W (mean 1/W folded), conv over H -> (H, H) bands, right-multiplied.
    a_hc_mx = sc_hc * _band(params["hc_w"][0, 0, :, 0], H).T
    a_hc_mn = (sc_hc / W) * _band(params["hc_w"][0, 1, :, 0], H).T

    # Constant 0/1 matrices: ZPool sums over H / W on the MXU, and their transposes
    # replicate the (C,W)/(C,H) gates back to the lane-dense (C, HW) layout.
    ar = jnp.arange(HW)
    p_sum_w = (ar[:, None] % W == jnp.arange(W)[None, :]).astype(jnp.float32)    # (HW, W)
    p_sum_h = (ar[:, None] // W == jnp.arange(H)[None, :]).astype(jnp.float32)   # (HW, H)
    p_bc_w = p_sum_w.T                                                           # (W, HW)
    p_bc_h = p_sum_h.T                                                           # (H, HW)

    w = params["w123"]
    scalars = jnp.concatenate(
        [jnp.stack([b_hw, b_cw, b_hc, w[0], w[1], w[2]]), t_hw_max, t_hw_mean]
    ).astype(jnp.float32)                                                        # (16,)

    # --- batch tiling: amortise the ~0.35us/grid-step fixed overhead ---------------
    slab_bytes = C * HW * x.dtype.itemsize
    bt = 1
    for d in range(1, B + 1):
        if B % d != 0 or d > 8:
            continue
        bt = d
        if d * slab_bytes >= (1 << 20):
            break

    # --- VMEM budget: actual footprint, capped at 3/4 of physical VMEM -------------
    mats = (a_cw_mx, a_cw_mn, a_hc_mx, a_hc_mn, p_sum_w, p_bc_w, p_sum_h, p_bc_h)
    mat_bytes = sum(int(m.size) * 4 for m in mats)
    io_bytes = 2 * bt * C * HW * x.dtype.itemsize          # x block + out block
    need = 2 * (io_bytes + mat_bytes) + (4 << 20)           # double buffers + scratch slack
    try:
        vmem_cap = int(pltpu.get_tpu_info().vmem_capacity_bytes)
    except Exception:
        vmem_cap = 64 << 20                                  # v7x-safe fallback
    vmem_limit = int(max(8 << 20, min(need, (vmem_cap * 3) // 4)))
    # TODO(synk): slabs too large for this budget need a two-pass (gate-compute /
    # tiled gate-apply) fallback; not required at these shapes.

    def full2d(a):
        return pl.BlockSpec(a.shape, lambda i: (0, 0))

    out = pl.pallas_call(
        _triplet_kernel,
        out_shape=jax.ShapeDtypeStruct((B, C, HW), x.dtype),
        grid=(B // bt,),
        in_specs=[
            pl.BlockSpec(memory_space=pltpu.MemorySpace.SMEM),     # scalars
            pl.BlockSpec((bt, C, HW), lambda i: (i, 0, 0)),        # x (flattened)
            full2d(a_cw_mx), full2d(a_cw_mn),
            full2d(a_hc_mx), full2d(a_hc_mn),
            full2d(p_sum_w), full2d(p_bc_w),
            full2d(p_sum_h), full2d(p_bc_h),
        ],
        out_specs=pl.BlockSpec((bt, C, HW), lambda i: (i, 0, 0)),
        compiler_params=pltpu.CompilerParams(
            dimension_semantics=("parallel",),
            vmem_limit_bytes=vmem_limit,
        ),
    )(scalars, x_flat, a_cw_mx, a_cw_mn, a_hc_mx, a_hc_mn,
      p_sum_w, p_bc_w, p_sum_h, p_bc_h)

    return out.reshape(B, C, H, W)


# ---------------------------------------------------------------------------
# Pure-JAX reference (mirrors the PyTorch module, eval-mode BN)
# ---------------------------------------------------------------------------
def _attention_gate_ref(xp, conv_w, bn):
    zmax = jnp.max(xp, axis=1)
    zmean = jnp.mean(xp, axis=1)
    z = jnp.stack([zmax, zmean], axis=1)                      # (B, 2, L, N)
    L = xp.shape[2]
    zp = jnp.pad(z, ((0, 0), (0, 0), (2, 2), (0, 0)))
    y = jnp.zeros((xp.shape[0], L, xp.shape[3]), jnp.float32)
    for c in range(2):
        for k in range(5):
            y = y + conv_w[0, c, k, 0] * zp[:, c, k:k + L, :]
    gamma, beta, r_mean, r_var, eps = bn
    y = (y - r_mean) / jnp.sqrt(r_var + eps) * gamma + beta
    s = jax.nn.sigmoid(y)
    return xp * s[:, None, :, :]


def triplet_attention_ref(x, params):
    xp1 = jnp.transpose(x, (0, 2, 1, 3))
    o11 = jnp.transpose(_attention_gate_ref(xp1, params["cw_w"], params["cw_bn"]),
                        (0, 2, 1, 3))
    xp2 = jnp.transpose(x, (0, 3, 2, 1))
    o21 = jnp.transpose(_attention_gate_ref(xp2, params["hc_w"], params["hc_bn"]),
                        (0, 3, 2, 1))
    o = _attention_gate_ref(x, params["hw_w"], params["hw_bn"])
    w = params["w123"]
    return w[0] * o + w[1] * o11 + w[2] * o21


# ---------------------------------------------------------------------------
if __name__ == "__main__":
    key = jax.random.PRNGKey(0)
    kp, kx = jax.random.split(key)
    params = init_params(kp)

    B, C, H, W = 2, 8, 16, 16
    x = jax.random.normal(kx, (B, C, H, W), jnp.float32)

    out = jax.block_until_ready(triplet_attention(x, params))
    ref = jax.block_until_ready(triplet_attention_ref(x, params))

    assert out.shape == (B, C, H, W)
    if not jnp.allclose(out, ref, rtol=1e-3, atol=1e-4):
        raise AssertionError("Pallas output does not match JAX reference")
    print("KERNEL_OK")
</pallas_src>

<mosaic_0001>
module attributes {stable_mosaic.version = 11 : i64} {
  func.func @_triplet_kernel(%arg0: i32, %arg1: memref<16xf32, #tpu.memory_space<smem>>, %arg2: memref<2x8x256xf32, #tpu.memory_space<vmem>>, %arg3: memref<8x8xf32, #tpu.memory_space<vmem>>, %arg4: memref<8x8xf32, #tpu.memory_space<vmem>>, %arg5: memref<16x16xf32, #tpu.memory_space<vmem>>, %arg6: memref<16x16xf32, #tpu.memory_space<vmem>>, %arg7: memref<256x16xf32, #tpu.memory_space<vmem>>, %arg8: memref<16x256xf32, #tpu.memory_space<vmem>>, %arg9: memref<256x16xf32, #tpu.memory_space<vmem>>, %arg10: memref<16x256xf32, #tpu.memory_space<vmem>>, %arg11: memref<2x8x256xf32, #tpu.memory_space<vmem>>) attributes {dimension_semantics = [#tpu.dimension_semantics<parallel>], iteration_bounds = array<i64: 1>, scalar_prefetch = 0 : i64, scratch_operands = 0 : i64, tpu.core_type = #tpu.core_type<tc>, window_params = [{transform_indices = @transform_0, window_bounds = array<i64: 16>}, {transform_indices = @transform_1, window_bounds = array<i64: 2, 8, 256>}, {pipeline_mode = #tpu.pipeline_mode<synchronous>, transform_indices = @transform_2, window_bounds = array<i64: 8, 8>}, {pipeline_mode = #tpu.pipeline_mode<synchronous>, transform_indices = @transform_3, window_bounds = array<i64: 8, 8>}, {pipeline_mode = #tpu.pipeline_mode<synchronous>, transform_indices = @transform_4, window_bounds = array<i64: 16, 16>}, {pipeline_mode = #tpu.pipeline_mode<synchronous>, transform_indices = @transform_5, window_bounds = array<i64: 16, 16>}, {pipeline_mode = #tpu.pipeline_mode<synchronous>, transform_indices = @transform_6, window_bounds = array<i64: 256, 16>}, {pipeline_mode = #tpu.pipeline_mode<synchronous>, transform_indices = @transform_7, window_bounds = array<i64: 16, 256>}, {pipeline_mode = #tpu.pipeline_mode<synchronous>, transform_indices = @transform_8, window_bounds = array<i64: 256, 16>}, {pipeline_mode = #tpu.pipeline_mode<synchronous>, transform_indices = @transform_9, window_bounds = array<i64: 16, 256>}, {transform_indices = @transform_10, window_bounds = array<i64: 2, 8, 256>}]} {
    %c0 = arith.constant 0 : index
    %c0_0 = arith.constant 0 : index
    %0 = vector.load %arg3[%c0, %c0_0] : memref<8x8xf32, #tpu.memory_space<vmem>>, vector<8x8xf32>
    %c0_1 = arith.constant 0 : index
    %c0_2 = arith.constant 0 : index
    %1 = vector.load %arg4[%c0_1, %c0_2] : memref<8x8xf32, #tpu.memory_space<vmem>>, vector<8x8xf32>
    %c0_3 = arith.constant 0 : index
    %c0_4 = arith.constant 0 : index
    %2 = vector.load %arg5[%c0_3, %c0_4] : memref<16x16xf32, #tpu.memory_space<vmem>>, vector<16x16xf32>
    %c0_5 = arith.constant 0 : index
    %c0_6 = arith.constant 0 : index
    %3 = vector.load %arg6[%c0_5, %c0_6] : memref<16x16xf32, #tpu.memory_space<vmem>>, vector<16x16xf32>
    %c0_7 = arith.constant 0 : index
    %c0_8 = arith.constant 0 : index
    %4 = vector.load %arg7[%c0_7, %c0_8] : memref<256x16xf32, #tpu.memory_space<vmem>>, vector<256x16xf32>
    %c0_9 = arith.constant 0 : index
    %c0_10 = arith.constant 0 : index
    %5 = vector.load %arg8[%c0_9, %c0_10] : memref<16x256xf32, #tpu.memory_space<vmem>>, vector<16x256xf32>
    %c0_11 = arith.constant 0 : index
    %c0_12 = arith.constant 0 : index
    %6 = vector.load %arg9[%c0_11, %c0_12] : memref<256x16xf32, #tpu.memory_space<vmem>>, vector<256x16xf32>
    %c0_13 = arith.constant 0 : index
    %c0_14 = arith.constant 0 : index
    %7 = vector.load %arg10[%c0_13, %c0_14] : memref<16x256xf32, #tpu.memory_space<vmem>>, vector<16x256xf32>
    %c0_15 = arith.constant 0 : index
    %8 = memref.load %arg1[%c0_15] : memref<16xf32, #tpu.memory_space<smem>>
    %c1 = arith.constant 1 : index
    %9 = memref.load %arg1[%c1] : memref<16xf32, #tpu.memory_space<smem>>
    %c2 = arith.constant 2 : index
    %10 = memref.load %arg1[%c2] : memref<16xf32, #tpu.memory_space<smem>>
    %c3 = arith.constant 3 : index
    %11 = memref.load %arg1[%c3] : memref<16xf32, #tpu.memory_space<smem>>
    %c4 = arith.constant 4 : index
    %12 = memref.load %arg1[%c4] : memref<16xf32, #tpu.memory_space<smem>>
    %c5 = arith.constant 5 : index
    %13 = memref.load %arg1[%c5] : memref<16xf32, #tpu.memory_space<smem>>
    %c0_i32 = arith.constant 0 : i32
    %14 = arith.index_cast %c0_i32 : i32 to index
    %c0_16 = arith.constant 0 : index
    %c0_17 = arith.constant 0 : index
    %15 = vector.load %arg2[%14, %c0_16, %c0_17] : memref<2x8x256xf32, #tpu.memory_space<vmem>>, vector<1x8x256xf32>
    %16 = vector.shape_cast %15 : vector<1x8x256xf32> to vector<8x256xf32>
    %cst = arith.constant dense<0xFF800000> : vector<256xf32>
    %17 = vector.multi_reduction <maximumf>, %16, %cst [0] : vector<8x256xf32> to vector<256xf32>
    %18 = vector.shape_cast %17 : vector<256xf32> to vector<1x256xf32>
    %cst_18 = arith.constant dense<0.000000e+00> : vector<256xf32>
    %19 = vector.multi_reduction <add>, %16, %cst_18 [0] : vector<8x256xf32> to vector<256xf32>
    %20 = vector.shape_cast %19 : vector<256xf32> to vector<1x256xf32>
    %cst_19 = arith.constant 0.000000e+00 : f32
    %21 = vector.broadcast %cst_19 : f32 to vector<1x256xf32>
    %c6 = arith.constant 6 : index
    %22 = memref.load %arg1[%c6] : memref<16xf32, #tpu.memory_space<smem>>
    %cst_20 = arith.constant 0.000000e+00 : f32
    %23 = vector.broadcast %cst_20 : f32 to vector<1x32xf32>
    %24 = vector.extract_strided_slice %18 {offsets = [0, 0], sizes = [1, 224], strides = [1, 1]} : vector<1x256xf32> to vector<1x224xf32>
    %25 = tpu.concatenate %23, %24 in 1 : vector<1x32xf32>, vector<1x224xf32> -> vector<1x256xf32>
    %26 = vector.broadcast %22 : f32 to vector<1x256xf32>
    %27 = arith.mulf %26, %25 : vector<1x256xf32>
    %28 = arith.addf %21, %27 : vector<1x256xf32>
    %c11 = arith.constant 11 : index
    %29 = memref.load %arg1[%c11] : memref<16xf32, #tpu.memory_space<smem>>
    %cst_21 = arith.constant 0.000000e+00 : f32
    %30 = vector.broadcast %cst_21 : f32 to vector<1x32xf32>
    %31 = vector.extract_strided_slice %20 {offsets = [0, 0], sizes = [1, 224], strides = [1, 1]} : vector<1x256xf32> to vector<1x224xf32>
    %32 = tpu.concatenate %30, %31 in 1 : vector<1x32xf32>, vector<1x224xf32> -> vector<1x256xf32>
    %33 = vector.broadcast %29 : f32 to vector<1x256xf32>
    %34 = arith.mulf %33, %32 : vector<1x256xf32>
    %35 = arith.addf %28, %34 : vector<1x256xf32>
    %c7 = arith.constant 7 : index
    %36 = memref.load %arg1[%c7] : memref<16xf32, #tpu.memory_space<smem>>
    %cst_22 = arith.constant 0.000000e+00 : f32
    %37 = vector.broadcast %cst_22 : f32 to vector<1x16xf32>
    %38 = vector.extract_strided_slice %18 {offsets = [0, 0], sizes = [1, 240], strides = [1, 1]} : vector<1x256xf32> to vector<1x240xf32>
    %39 = tpu.concatenate %37, %38 in 1 : vector<1x16xf32>, vector<1x240xf32> -> vector<1x256xf32>
    %40 = vector.broadcast %36 : f32 to vector<1x256xf32>
    %41 = arith.mulf %40, %39 : vector<1x256xf32>
    %42 = arith.addf %35, %41 : vector<1x256xf32>
    %c12 = arith.constant 12 : index
    %43 = memref.load %arg1[%c12] : memref<16xf32, #tpu.memory_space<smem>>
    %cst_23 = arith.constant 0.000000e+00 : f32
    %44 = vector.broadcast %cst_23 : f32 to vector<1x16xf32>
    %45 = vector.extract_strided_slice %20 {offsets = [0, 0], sizes = [1, 240], strides = [1, 1]} : vector<1x256xf32> to vector<1x240xf32>
    %46 = tpu.concatenate %44, %45 in 1 : vector<1x16xf32>, vector<1x240xf32> -> vector<1x256xf32>
    %47 = vector.broadcast %43 : f32 to vector<1x256xf32>
    %48 = arith.mulf %47, %46 : vector<1x256xf32>
    %49 = arith.addf %42, %48 : vector<1x256xf32>
    %c8 = arith.constant 8 : index
    %50 = memref.load %arg1[%c8] : memref<16xf32, #tpu.memory_space<smem>>
    %51 = vector.broadcast %50 : f32 to vector<1x256xf32>
    %52 = arith.mulf %51, %18 : vector<1x256xf32>
    %53 = arith.addf %49, %52 : vector<1x256xf32>
    %c13 = arith.constant 13 : index
    %54 = memref.load %arg1[%c13] : memref<16xf32, #tpu.memory_space<smem>>
    %55 = vector.broadcast %54 : f32 to vector<1x256xf32>
    %56 = arith.mulf %55, %20 : vector<1x256xf32>
    %57 = arith.addf %53, %56 : vector<1x256xf32>
    %c9 = arith.constant 9 : index
    %58 = memref.load %arg1[%c9] : memref<16xf32, #tpu.memory_space<smem>>
    %cst_24 = arith.constant 0.000000e+00 : f32
    %59 = vector.broadcast %cst_24 : f32 to vector<1x16xf32>
    %60 = vector.extract_strided_slice %18 {offsets = [0, 16], sizes = [1, 240], strides = [1, 1]} : vector<1x256xf32> to vector<1x240xf32>
    %61 = tpu.concatenate %60, %59 in 1 : vector<1x240xf32>, vector<1x16xf32> -> vector<1x256xf32>
    %62 = vector.broadcast %58 : f32 to vector<1x256xf32>
    %63 = arith.mulf %62, %61 : vector<1x256xf32>
    %64 = arith.addf %57, %63 : vector<1x256xf32>
    %c14 = arith.constant 14 : index
    %65 = memref.load %arg1[%c14] : memref<16xf32, #tpu.memory_space<smem>>
    %cst_25 = arith.constant 0.000000e+00 : f32
    %66 = vector.broadcast %cst_25 : f32 to vector<1x16xf32>
    %67 = vector.extract_strided_slice %20 {offsets = [0, 16], sizes = [1, 240], strides = [1, 1]} : vector<1x256xf32> to vector<1x240xf32>
    %68 = tpu.concatenate %67, %66 in 1 : vector<1x240xf32>, vector<1x16xf32> -> vector<1x256xf32>
    %69 = vector.broadcast %65 : f32 to vector<1x256xf32>
    %70 = arith.mulf %69, %68 : vector<1x256xf32>
    %71 = arith.addf %64, %70 : vector<1x256xf32>
    %c10 = arith.constant 10 : index
    %72 = memref.load %arg1[%c10] : memref<16xf32, #tpu.memory_space<smem>>
    %cst_26 = arith.constant 0.000000e+00 : f32
    %73 = vector.broadcast %cst_26 : f32 to vector<1x32xf32>
    %74 = vector.extract_strided_slice %18 {offsets = [0, 32], sizes = [1, 224], strides = [1, 1]} : vector<1x256xf32> to vector<1x224xf32>
    %75 = tpu.concatenate %74, %73 in 1 : vector<1x224xf32>, vector<1x32xf32> -> vector<1x256xf32>
    %76 = vector.broadcast %72 : f32 to vector<1x256xf32>
    %77 = arith.mulf %76, %75 : vector<1x256xf32>
    %78 = arith.addf %71, %77 : vector<1x256xf32>
    %c15 = arith.constant 15 : index
    %79 = memref.load %arg1[%c15] : memref<16xf32, #tpu.memory_space<smem>>
    %cst_27 = arith.constant 0.000000e+00 : f32
    %80 = vector.broadcast %cst_27 : f32 to vector<1x32xf32>
    %81 = vector.extract_strided_slice %20 {offsets = [0, 32], sizes = [1, 224], strides = [1, 1]} : vector<1x256xf32> to vector<1x224xf32>
    %82 = tpu.concatenate %81, %80 in 1 : vector<1x224xf32>, vector<1x32xf32> -> vector<1x256xf32>
    %83 = vector.broadcast %79 : f32 to vector<1x256xf32>
    %84 = arith.mulf %83, %82 : vector<1x256xf32>
    %85 = arith.addf %78, %84 : vector<1x256xf32>
    %86 = vector.broadcast %8 : f32 to vector<1x256xf32>
    %87 = arith.addf %85, %86 : vector<1x256xf32>
    %cst_28 = arith.constant 0.000000e+00 : f32
    %88 = vector.broadcast %cst_28 : f32 to vector<1x256xf32>
    %89 = arith.subf %88, %87 : vector<1x256xf32>
    %90 = math.exp %89 : vector<1x256xf32>
    %cst_29 = arith.constant 1.000000e+00 : f32
    %91 = vector.broadcast %cst_29 : f32 to vector<1x256xf32>
    %92 = arith.addf %91, %90 : vector<1x256xf32>
    %93 = tpu.reciprocal %92 : vector<1x256xf32> -> vector<1x256xf32>
    %94 = vector.extract_strided_slice %16 {offsets = [0, 0], sizes = [8, 16], strides = [1, 1]} : vector<8x256xf32> to vector<8x16xf32>
    %cst_30 = arith.constant dense<0xFF800000> : vector<8xf32>
    %95 = vector.multi_reduction <maximumf>, %94, %cst_30 [1] : vector<8x16xf32> to vector<8xf32>
    %96 = vector.shape_cast %95 : vector<8xf32> to vector<8x1xf32>
    %97 = vector.extract_strided_slice %16 {offsets = [0, 16], sizes = [8, 16], strides = [1, 1]} : vector<8x256xf32> to vector<8x16xf32>
    %98 = arith.maximumf %94, %97 : vector<8x16xf32>
    %cst_31 = arith.constant dense<0xFF800000> : vector<8xf32>
    %99 = vector.multi_reduction <maximumf>, %97, %cst_31 [1] : vector<8x16xf32> to vector<8xf32>
    %100 = vector.shape_cast %99 : vector<8xf32> to vector<8x1xf32>
    %101 = vector.extract_strided_slice %16 {offsets = [0, 32], sizes = [8, 16], strides = [1, 1]} : vector<8x256xf32> to vector<8x16xf32>
    %102 = arith.maximumf %98, %101 : vector<8x16xf32>
    %cst_32 = arith.constant dense<0xFF800000> : vector<8xf32>
    %103 = vector.multi_reduction <maximumf>, %101, %cst_32 [1] : vector<8x16xf32> to vector<8xf32>
    %104 = vector.shape_cast %103 : vector<8xf32> to vector<8x1xf32>
    %105 = vector.extract_strided_slice %16 {offsets = [0, 48], sizes = [8, 16], strides = [1, 1]} : vector<8x256xf32> to vector<8x16xf32>
    %106 = arith.maximumf %102, %105 : vector<8x16xf32>
    %cst_33 = arith.constant dense<0xFF800000> : vector<8xf32>
    %107 = vector.multi_reduction <maximumf>, %105, %cst_33 [1] : vector<8x16xf32> to vector<8xf32>
    %108 = vector.shape_cast %107 : vector<8xf32> to vector<8x1xf32>
    %109 = vector.extract_strided_slice %16 {offsets = [0, 64], sizes = [8, 16], strides = [1, 1]} : vector<8x256xf32> to vector<8x16xf32>
    %110 = arith.maximumf %106, %109 : vector<8x16xf32>
    %cst_34 = arith.constant dense<0xFF800000> : vector<8xf32>
    %111 = vector.multi_reduction <maximumf>, %109, %cst_34 [1] : vector<8x16xf32> to vector<8xf32>
    %112 = vector.shape_cast %111 : vector<8xf32> to vector<8x1xf32>
    %113 = vector.extract_strided_slice %16 {offsets = [0, 80], sizes = [8, 16], strides = [1, 1]} : vector<8x256xf32> to vector<8x16xf32>
    %114 = arith.maximumf %110, %113 : vector<8x16xf32>
    %cst_35 = arith.constant dense<0xFF800000> : vector<8xf32>
    %115 = vector.multi_reduction <maximumf>, %113, %cst_35 [1] : vector<8x16xf32> to vector<8xf32>
    %116 = vector.shape_cast %115 : vector<8xf32> to vector<8x1xf32>
    %117 = vector.extract_strided_slice %16 {offsets = [0, 96], sizes = [8, 16], strides = [1, 1]} : vector<8x256xf32> to vector<8x16xf32>
    %118 = arith.maximumf %114, %117 : vector<8x16xf32>
    %cst_36 = arith.constant dense<0xFF800000> : vector<8xf32>
    %119 = vector.multi_reduction <maximumf>, %117, %cst_36 [1] : vector<8x16xf32> to vector<8xf32>
    %120 = vector.shape_cast %119 : vector<8xf32> to vector<8x1xf32>
    %121 = vector.extract_strided_slice %16 {offsets = [0, 112], sizes = [8, 16], strides = [1, 1]} : vector<8x256xf32> to vector<8x16xf32>
    %122 = arith.maximumf %118, %121 : vector<8x16xf32>
    %cst_37 = arith.constant dense<0xFF800000> : vector<8xf32>
    %123 = vector.multi_reduction <maximumf>, %121, %cst_37 [1] : vector<8x16xf32> to vector<8xf32>
    %124 = vector.shape_cast %123 : vector<8xf32> to vector<8x1xf32>
    %125 = vector.extract_strided_slice %16 {offsets = [0, 128], sizes = [8, 16], strides = [1, 1]} : vector<8x256xf32> to vector<8x16xf32>
    %126 = arith.maximumf %122, %125 : vector<8x16xf32>
    %cst_38 = arith.constant dense<0xFF800000> : vector<8xf32>
    %127 = vector.multi_reduction <maximumf>, %125, %cst_38 [1] : vector<8x16xf32> to vector<8xf32>
    %128 = vector.shape_cast %127 : vector<8xf32> to vector<8x1xf32>
    %129 = vector.extract_strided_slice %16 {offsets = [0, 144], sizes = [8, 16], strides = [1, 1]} : vector<8x256xf32> to vector<8x16xf32>
    %130 = arith.maximumf %126, %129 : vector<8x16xf32>
    %cst_39 = arith.constant dense<0xFF800000> : vector<8xf32>
    %131 = vector.multi_reduction <maximumf>, %129, %cst_39 [1] : vector<8x16xf32> to vector<8xf32>
    %132 = vector.shape_cast %131 : vector<8xf32> to vector<8x1xf32>
    %133 = vector.extract_strided_slice %16 {offsets = [0, 160], sizes = [8, 16], strides = [1, 1]} : vector<8x256xf32> to vector<8x16xf32>
    %134 = arith.maximumf %130, %133 : vector<8x16xf32>
    %cst_40 = arith.constant dense<0xFF800000> : vector<8xf32>
    %135 = vector.multi_reduction <maximumf>, %133, %cst_40 [1] : vector<8x16xf32> to vector<8xf32>
    %136 = vector.shape_cast %135 : vector<8xf32> to vector<8x1xf32>
    %137 = vector.extract_strided_slice %16 {offsets = [0, 176], sizes = [8, 16], strides = [1, 1]} : vector<8x256xf32> to vector<8x16xf32>
    %138 = arith.maximumf %134, %137 : vector<8x16xf32>
    %cst_41 = arith.constant dense<0xFF800000> : vector<8xf32>
    %139 = vector.multi_reduction <maximumf>, %137, %cst_41 [1] : vector<8x16xf32> to vector<8xf32>
    %140 = vector.shape_cast %139 : vector<8xf32> to vector<8x1xf32>
    %141 = vector.extract_strided_slice %16 {offsets = [0, 192], sizes = [8, 16], strides = [1, 1]} : vector<8x256xf32> to vector<8x16xf32>
    %142 = arith.maximumf %138, %141 : vector<8x16xf32>
    %cst_42 = arith.constant dense<0xFF800000> : vector<8xf32>
    %143 = vector.multi_reduction <maximumf>, %141, %cst_42 [1] : vector<8x16xf32> to vector<8xf32>
    %144 = vector.shape_cast %143 : vector<8xf32> to vector<8x1xf32>
    %145 = vector.extract_strided_slice %16 {offsets = [0, 208], sizes = [8, 16], strides = [1, 1]} : vector<8x256xf32> to vector<8x16xf32>
    %146 = arith.maximumf %142, %145 : vector<8x16xf32>
    %cst_43 = arith.constant dense<0xFF800000> : vector<8xf32>
    %147 = vector.multi_reduction <maximumf>, %145, %cst_43 [1] : vector<8x16xf32> to vector<8xf32>
    %148 = vector.shape_cast %147 : vector<8xf32> to vector<8x1xf32>
    %149 = vector.extract_strided_slice %16 {offsets = [0, 224], sizes = [8, 16], strides = [1, 1]} : vector<8x256xf32> to vector<8x16xf32>
    %150 = arith.maximumf %146, %149 : vector<8x16xf32>
    %cst_44 = arith.constant dense<0xFF800000> : vector<8xf32>
    %151 = vector.multi_reduction <maximumf>, %149, %cst_44 [1] : vector<8x16xf32> to vector<8xf32>
    %152 = vector.shape_cast %151 : vector<8xf32> to vector<8x1xf32>
    %153 = vector.extract_strided_slice %16 {offsets = [0, 240], sizes = [8, 16], strides = [1, 1]} : vector<8x256xf32> to vector<8x16xf32>
    %154 = arith.maximumf %150, %153 : vector<8x16xf32>
    %cst_45 = arith.constant dense<0xFF800000> : vector<8xf32>
    %155 = vector.multi_reduction <maximumf>, %153, %cst_45 [1] : vector<8x16xf32> to vector<8xf32>
    %156 = vector.shape_cast %155 : vector<8xf32> to vector<8x1xf32>
    %157 = tpu.concatenate %96, %100, %104, %108, %112, %116, %120, %124, %128, %132, %136, %140, %144, %148, %152, %156 in 1 : vector<8x1xf32>, vector<8x1xf32>, vector<8x1xf32>, vector<8x1xf32>, vector<8x1xf32>, vector<8x1xf32>, vector<8x1xf32>, vector<8x1xf32>, vector<8x1xf32>, vector<8x1xf32>, vector<8x1xf32>, vector<8x1xf32>, vector<8x1xf32>, vector<8x1xf32>, vector<8x1xf32>, vector<8x1xf32> -> vector<8x16xf32>
    %cst_46 = arith.constant dense<0.000000e+00> : vector<8x16xf32>
    %158 = tpu.matmul %16, %4, %cst_46 {dimension_numbers = #tpu.dot_dimension_numbers<[1], [0], [0], [1], [0, 0, 1, 1], [], []>} : vector<8x256xf32>, vector<256x16xf32>, vector<8x16xf32> -> vector<8x16xf32>
    %cst_47 = arith.constant dense<0.000000e+00> : vector<8x16xf32>
    %159 = tpu.matmul %16, %6, %cst_47 {dimension_numbers = #tpu.dot_dimension_numbers<[1], [0], [0], [1], [0, 0, 1, 1], [], []>} : vector<8x256xf32>, vector<256x16xf32>, vector<8x16xf32> -> vector<8x16xf32>
    %cst_48 = arith.constant dense<0.000000e+00> : vector<8x16xf32>
    %160 = tpu.matmul %0, %154, %cst_48 {dimension_numbers = #tpu.dot_dimension_numbers<[1], [0], [0], [1], [0, 0, 1, 1], [], []>} : vector<8x8xf32>, vector<8x16xf32>, vector<8x16xf32> -> vector<8x16xf32>
    %cst_49 = arith.constant dense<0.000000e+00> : vector<8x16xf32>
    %161 = tpu.matmul %1, %158, %cst_49 {dimension_numbers = #tpu.dot_dimension_numbers<[1], [0], [0], [1], [0, 0, 1, 1], [], []>} : vector<8x8xf32>, vector<8x16xf32>, vector<8x16xf32> -> vector<8x16xf32>
    %162 = arith.addf %160, %161 : vector<8x16xf32>
    %163 = vector.broadcast %9 : f32 to vector<8x16xf32>
    %164 = arith.addf %162, %163 : vector<8x16xf32>
    %cst_50 = arith.constant 0.000000e+00 : f32
    %165 = vector.broadcast %cst_50 : f32 to vector<8x16xf32>
    %166 = arith.subf %165, %164 : vector<8x16xf32>
    %167 = math.exp %166 : vector<8x16xf32>
    %cst_51 = arith.constant 1.000000e+00 : f32
    %168 = vector.broadcast %cst_51 : f32 to vector<8x16xf32>
    %169 = arith.addf %168, %167 : vector<8x16xf32>
    %170 = tpu.reciprocal %169 : vector<8x16xf32> -> vector<8x16xf32>
    %cst_52 = arith.constant dense<0.000000e+00> : vector<8x16xf32>
    %171 = tpu.matmul %157, %2, %cst_52 {dimension_numbers = #tpu.dot_dimension_numbers<[1], [0], [0], [1], [0, 0, 1, 1], [], []>} : vector<8x16xf32>, vector<16x16xf32>, vector<8x16xf32> -> vector<8x16xf32>
    %cst_53 = arith.constant dense<0.000000e+00> : vector<8x16xf32>
    %172 = tpu.matmul %159, %3, %cst_53 {dimension_numbers = #tpu.dot_dimension_numbers<[1], [0], [0], [1], [0, 0, 1, 1], [], []>} : vector<8x16xf32>, vector<16x16xf32>, vector<8x16xf32> -> vector<8x16xf32>
    %173 = arith.addf %171, %172 : vector<8x16xf32>
    %174 = vector.broadcast %10 : f32 to vector<8x16xf32>
    %175 = arith.addf %173, %174 : vector<8x16xf32>
    %cst_54 = arith.constant 0.000000e+00 : f32
    %176 = vector.broadcast %cst_54 : f32 to vector<8x16xf32>
    %177 = arith.subf %176, %175 : vector<8x16xf32>
    %178 = math.exp %177 : vector<8x16xf32>
    %cst_55 = arith.constant 1.000000e+00 : f32
    %179 = vector.broadcast %cst_55 : f32 to vector<8x16xf32>
    %180 = arith.addf %179, %178 : vector<8x16xf32>
    %181 = tpu.reciprocal %180 : vector<8x16xf32> -> vector<8x16xf32>
    %182 = vector.broadcast %11 : f32 to vector<1x256xf32>
    %183 = arith.mulf %182, %93 : vector<1x256xf32>
    %184 = vector.broadcast %12 : f32 to vector<8x16xf32>
    %185 = arith.mulf %184, %170 : vector<8x16xf32>
    %cst_56 = arith.constant dense<0.000000e+00> : vector<8x256xf32>
    %186 = tpu.matmul %185, %5, %cst_56 {dimension_numbers = #tpu.dot_dimension_numbers<[1], [0], [0], [1], [0, 0, 1, 1], [], []>} : vector<8x16xf32>, vector<16x256xf32>, vector<8x256xf32> -> vector<8x256xf32>
    %187 = vector.broadcast %183 : vector<1x256xf32> to vector<8x256xf32>
    %188 = arith.addf %187, %186 : vector<8x256xf32>
    %189 = vector.broadcast %13 : f32 to vector<8x16xf32>
    %190 = arith.mulf %189, %181 : vector<8x16xf32>
    %cst_57 = arith.constant dense<0.000000e+00> : vector<8x256xf32>
    %191 = tpu.matmul %190, %7, %cst_57 {dimension_numbers = #tpu.dot_dimension_numbers<[1], [0], [0], [1], [0, 0, 1, 1], [], []>} : vector<8x16xf32>, vector<16x256xf32>, vector<8x256xf32> -> vector<8x256xf32>
    %192 = arith.addf %188, %191 : vector<8x256xf32>
    %193 = arith.mulf %16, %192 : vector<8x256xf32>
    %194 = arith.index_cast %c0_i32 : i32 to index
    %c0_58 = arith.constant 0 : index
    %c0_59 = arith.constant 0 : index
    %195 = vector.load %arg11[%194, %c0_58, %c0_59] : memref<2x8x256xf32, #tpu.memory_space<vmem>>, vector<1x8x256xf32>
    %196 = vector.shape_cast %195 : vector<1x8x256xf32> to vector<8x256xf32>
    %197 = vector.shape_cast %193 : vector<8x256xf32> to vector<1x8x256xf32>
    tpu.vector_store %arg11[%194, %c0_58, %c0_59], %197 {strides = array<i32>} : memref<2x8x256xf32, #tpu.memory_space<vmem>>, vector<1x8x256xf32>,
    %c1_i32 = arith.constant 1 : i32
    %198 = arith.index_cast %c1_i32 : i32 to index
    %c0_60 = arith.constant 0 : index
    %c0_61 = arith.constant 0 : index
    %199 = vector.load %arg2[%198, %c0_60, %c0_61] : memref<2x8x256xf32, #tpu.memory_space<vmem>>, vector<1x8x256xf32>
    %200 = vector.shape_cast %199 : vector<1x8x256xf32> to vector<8x256xf32>
    %cst_62 = arith.constant dense<0xFF800000> : vector<256xf32>
    %201 = vector.multi_reduction <maximumf>, %200, %cst_62 [0] : vector<8x256xf32> to vector<256xf32>
    %202 = vector.shape_cast %201 : vector<256xf32> to vector<1x256xf32>
    %cst_63 = arith.constant dense<0.000000e+00> : vector<256xf32>
    %203 = vector.multi_reduction <add>, %200, %cst_63 [0] : vector<8x256xf32> to vector<256xf32>
    %204 = vector.shape_cast %203 : vector<256xf32> to vector<1x256xf32>
    %cst_64 = arith.constant 0.000000e+00 : f32
    %205 = vector.broadcast %cst_64 : f32 to vector<1x256xf32>
    %c6_65 = arith.constant 6 : index
    %206 = memref.load %arg1[%c6_65] : memref<16xf32, #tpu.memory_space<smem>>
    %cst_66 = arith.constant 0.000000e+00 : f32
    %207 = vector.broadcast %cst_66 : f32 to vector<1x32xf32>
    %208 = vector.extract_strided_slice %202 {offsets = [0, 0], sizes = [1, 224], strides = [1, 1]} : vector<1x256xf32> to vector<1x224xf32>
    %209 = tpu.concatenate %207, %208 in 1 : vector<1x32xf32>, vector<1x224xf32> -> vector<1x256xf32>
    %210 = vector.broadcast %206 : f32 to vector<1x256xf32>
    %211 = arith.mulf %210, %209 : vector<1x256xf32>
    %212 = arith.addf %205, %211 : vector<1x256xf32>
    %c11_67 = arith.constant 11 : index
    %213 = memref.load %arg1[%c11_67] : memref<16xf32, #tpu.memory_space<smem>>
    %cst_68 = arith.constant 0.000000e+00 : f32
    %214 = vector.broadcast %cst_68 : f32 to vector<1x32xf32>
    %215 = vector.extract_strided_slice %204 {offsets = [0, 0], sizes = [1, 224], strides = [1, 1]} : vector<1x256xf32> to vector<1x224xf32>
    %216 = tpu.concatenate %214, %215 in 1 : vector<1x32xf32>, vector<1x224xf32> -> vector<1x256xf32>
    %217 = vector.broadcast %213 : f32 to vector<1x256xf32>
    %218 = arith.mulf %217, %216 : vector<1x256xf32>
    %219 = arith.addf %212, %218 : vector<1x256xf32>
    %c7_69 = arith.constant 7 : index
    %220 = memref.load %arg1[%c7_69] : memref<16xf32, #tpu.memory_space<smem>>
    %cst_70 = arith.constant 0.000000e+00 : f32
    %221 = vector.broadcast %cst_70 : f32 to vector<1x16xf32>
    %222 = vector.extract_strided_slice %202 {offsets = [0, 0], sizes = [1, 240], strides = [1, 1]} : vector<1x256xf32> to vector<1x240xf32>
    %223 = tpu.concatenate %221, %222 in 1 : vector<1x16xf32>, vector<1x240xf32> -> vector<1x256xf32>
    %224 = vector.broadcast %220 : f32 to vector<1x256xf32>
    %225 = arith.mulf %224, %223 : vector<1x256xf32>
    %226 = arith.addf %219, %225 : vector<1x256xf32>
    %c12_71 = arith.constant 12 : index
    %227 = memref.load %arg1[%c12_71] : memref<16xf32, #tpu.memory_space<smem>>
    %cst_72 = arith.constant 0.000000e+00 : f32
    %228 = vector.broadcast %cst_72 : f32 to vector<1x16xf32>
    %229 = vector.extract_strided_slice %204 {offsets = [0, 0], sizes = [1, 240], strides = [1, 1]} : vector<1x256xf32> to vector<1x240xf32>
    %230 = tpu.concatenate %228, %229 in 1 : vector<1x16xf32>, vector<1x240xf32> -> vector<1x256xf32>
    %231 = vector.broadcast %227 : f32 to vector<1x256xf32>
    %232 = arith.mulf %231, %230 : vector<1x256xf32>
    %233 = arith.addf %226, %232 : vector<1x256xf32>
    %c8_73 = arith.constant 8 : index
    %234 = memref.load %arg1[%c8_73] : memref<16xf32, #tpu.memory_space<smem>>
    %235 = vector.broadcast %234 : f32 to vector<1x256xf32>
    %236 = arith.mulf %235, %202 : vector<1x256xf32>
    %237 = arith.addf %233, %236 : vector<1x256xf32>
    %c13_74 = arith.constant 13 : index
    %238 = memref.load %arg1[%c13_74] : memref<16xf32, #tpu.memory_space<smem>>
    %239 = vector.broadcast %238 : f32 to vector<1x256xf32>
    %240 = arith.mulf %239, %204 : vector<1x256xf32>
    %241 = arith.addf %237, %240 : vector<1x256xf32>
    %c9_75 = arith.constant 9 : index
    %242 = memref.load %arg1[%c9_75] : memref<16xf32, #tpu.memory_space<smem>>
    %cst_76 = arith.constant 0.000000e+00 : f32
    %243 = vector.broadcast %cst_76 : f32 to vector<1x16xf32>
    %244 = vector.extract_strided_slice %202 {offsets = [0, 16], sizes = [1, 240], strides = [1, 1]} : vector<1x256xf32> to vector<1x240xf32>
    %245 = tpu.concatenate %244, %243 in 1 : vector<1x240xf32>, vector<1x16xf32> -> vector<1x256xf32>
    %246 = vector.broadcast %242 : f32 to vector<1x256xf32>
    %247 = arith.mulf %246, %245 : vector<1x256xf32>
    %248 = arith.addf %241, %247 : vector<1x256xf32>
    %c14_77 = arith.constant 14 : index
    %249 = memref.load %arg1[%c14_77] : memref<16xf32, #tpu.memory_space<smem>>
    %cst_78 = arith.constant 0.000000e+00 : f32
    %250 = vector.broadcast %cst_78 : f32 to vector<1x16xf32>
    %251 = vector.extract_strided_slice %204 {offsets = [0, 16], sizes = [1, 240], strides = [1, 1]} : vector<1x256xf32> to vector<1x240xf32>
    %252 = tpu.concatenate %251, %250 in 1 : vector<1x240xf32>, vector<1x16xf32> -> vector<1x256xf32>
    %253 = vector.broadcast %249 : f32 to vector<1x256xf32>
    %254 = arith.mulf %253, %252 : vector<1x256xf32>
    %255 = arith.addf %248, %254 : vector<1x256xf32>
    %c10_79 = arith.constant 10 : index
    %256 = memref.load %arg1[%c10_79] : memref<16xf32, #tpu.memory_space<smem>>
    %cst_80 = arith.constant 0.000000e+00 : f32
    %257 = vector.broadcast %cst_80 : f32 to vector<1x32xf32>
    %258 = vector.extract_strided_slice %202 {offsets = [0, 32], sizes = [1, 224], strides = [1, 1]} : vector<1x256xf32> to vector<1x224xf32>
    %259 = tpu.concatenate %258, %257 in 1 : vector<1x224xf32>, vector<1x32xf32> -> vector<1x256xf32>
    %260 = vector.broadcast %256 : f32 to vector<1x256xf32>
    %261 = arith.mulf %260, %259 : vector<1x256xf32>
    %262 = arith.addf %255, %261 : vector<1x256xf32>
    %c15_81 = arith.constant 15 : index
    %263 = memref.load %arg1[%c15_81] : memref<16xf32, #tpu.memory_space<smem>>
    %cst_82 = arith.constant 0.000000e+00 : f32
    %264 = vector.broadcast %cst_82 : f32 to vector<1x32xf32>
    %265 = vector.extract_strided_slice %204 {offsets = [0, 32], sizes = [1, 224], strides = [1, 1]} : vector<1x256xf32> to vector<1x224xf32>
    %266 = tpu.concatenate %265, %264 in 1 : vector<1x224xf32>, vector<1x32xf32> -> vector<1x256xf32>
    %267 = vector.broadcast %263 : f32 to vector<1x256xf32>
    %268 = arith.mulf %267, %266 : vector<1x256xf32>
    %269 = arith.addf %262, %268 : vector<1x256xf32>
    %270 = vector.broadcast %8 : f32 to vector<1x256xf32>
    %271 = arith.addf %269, %270 : vector<1x256xf32>
    %cst_83 = arith.constant 0.000000e+00 : f32
    %272 = vector.broadcast %cst_83 : f32 to vector<1x256xf32>
    %273 = arith.subf %272, %271 : vector<1x256xf32>
    %274 = math.exp %273 : vector<1x256xf32>
    %cst_84 = arith.constant 1.000000e+00 : f32
    %275 = vector.broadcast %cst_84 : f32 to vector<1x256xf32>
    %276 = arith.addf %275, %274 : vector<1x256xf32>
    %277 = tpu.reciprocal %276 : vector<1x256xf32> -> vector<1x256xf32>
    %278 = vector.extract_strided_slice %200 {offsets = [0, 0], sizes = [8, 16], strides = [1, 1]} : vector<8x256xf32> to vector<8x16xf32>
    %cst_85 = arith.constant dense<0xFF800000> : vector<8xf32>
    %279 = vector.multi_reduction <maximumf>, %278, %cst_85 [1] : vector<8x16xf32> to vector<8xf32>
    %280 = vector.shape_cast %279 : vector<8xf32> to vector<8x1xf32>
    %281 = vector.extract_strided_slice %200 {offsets = [0, 16], sizes = [8, 16], strides = [1, 1]} : vector<8x256xf32> to vector<8x16xf32>
    %282 = arith.maximumf %278, %281 : vector<8x16xf32>
    %cst_86 = arith.constant dense<0xFF800000> : vector<8xf32>
    %283 = vector.multi_reduction <maximumf>, %281, %cst_86 [1] : vector<8x16xf32> to vector<8xf32>
    %284 = vector.shape_cast %283 : vector<8xf32> to vector<8x1xf32>
    %285 = vector.extract_strided_slice %200 {offsets = [0, 32], sizes = [8, 16], strides = [1, 1]} : vector<8x256xf32> to vector<8x16xf32>
    %286 = arith.maximumf %282, %285 : vector<8x16xf32>
    %cst_87 = arith.constant dense<0xFF800000> : vector<8xf32>
    %287 = vector.multi_reduction <maximumf>, %285, %cst_87 [1] : vector<8x16xf32> to vector<8xf32>
    %288 = vector.shape_cast %287 : vector<8xf32> to vector<8x1xf32>
    %289 = vector.extract_strided_slice %200 {offsets = [0, 48], sizes = [8, 16], strides = [1, 1]} : vector<8x256xf32> to vector<8x16xf32>
    %290 = arith.maximumf %286, %289 : vector<8x16xf32>
    %cst_88 = arith.constant dense<0xFF800000> : vector<8xf32>
    %291 = vector.multi_reduction <maximumf>, %289, %cst_88 [1] : vector<8x16xf32> to vector<8xf32>
    %292 = vector.shape_cast %291 : vector<8xf32> to vector<8x1xf32>
    %293 = vector.extract_strided_slice %200 {offsets = [0, 64], sizes = [8, 16], strides = [1, 1]} : vector<8x256xf32> to vector<8x16xf32>
    %294 = arith.maximumf %290, %293 : vector<8x16xf32>
    %cst_89 = arith.constant dense<0xFF800000> : vector<8xf32>
    %295 = vector.multi_reduction <maximumf>, %293, %cst_89 [1] : vector<8x16xf32> to vector<8xf32>
    %296 = vector.shape_cast %295 : vector<8xf32> to vector<8x1xf32>
    %297 = vector.extract_strided_slice %200 {offsets = [0, 80], sizes = [8, 16], strides = [1, 1]} : vector<8x256xf32> to vector<8x16xf32>
    %298 = arith.maximumf %294, %297 : vector<8x16xf32>
    %cst_90 = arith.constant dense<0xFF800000> : vector<8xf32>
    %299 = vector.multi_reduction <maximumf>, %297, %cst_90 [1] : vector<8x16xf32> to vector<8xf32>
    %300 = vector.shape_cast %299 : vector<8xf32> to vector<8x1xf32>
    %301 = vector.extract_strided_slice %200 {offsets = [0, 96], sizes = [8, 16], strides = [1, 1]} : vector<8x256xf32> to vector<8x16xf32>
    %302 = arith.maximumf %298, %301 : vector<8x16xf32>
    %cst_91 = arith.constant dense<0xFF800000> : vector<8xf32>
    %303 = vector.multi_reduction <maximumf>, %301, %cst_91 [1] : vector<8x16xf32> to vector<8xf32>
    %304 = vector.shape_cast %303 : vector<8xf32> to vector<8x1xf32>
    %305 = vector.extract_strided_slice %200 {offsets = [0, 112], sizes = [8, 16], strides = [1, 1]} : vector<8x256xf32> to vector<8x16xf32>
    %306 = arith.maximumf %302, %305 : vector<8x16xf32>
    %cst_92 = arith.constant dense<0xFF800000> : vector<8xf32>
    %307 = vector.multi_reduction <maximumf>, %305, %cst_92 [1] : vector<8x16xf32> to vector<8xf32>
    %308 = vector.shape_cast %307 : vector<8xf32> to vector<8x1xf32>
    %309 = vector.extract_strided_slice %200 {offsets = [0, 128], sizes = [8, 16], strides = [1, 1]} : vector<8x256xf32> to vector<8x16xf32>
    %310 = arith.maximumf %306, %309 : vector<8x16xf32>
    %cst_93 = arith.constant dense<0xFF800000> : vector<8xf32>
    %311 = vector.multi_reduction <maximumf>, %309, %cst_93 [1] : vector<8x16xf32> to vector<8xf32>
    %312 = vector.shape_cast %311 : vector<8xf32> to vector<8x1xf32>
    %313 = vector.extract_strided_slice %200 {offsets = [0, 144], sizes = [8, 16], strides = [1, 1]} : vector<8x256xf32> to vector<8x16xf32>
    %314 = arith.maximumf %310, %313 : vector<8x16xf32>
    %cst_94 = arith.constant dense<0xFF800000> : vector<8xf32>
    %315 = vector.multi_reduction <maximumf>, %313, %cst_94 [1] : vector<8x16xf32> to vector<8xf32>
    %316 = vector.shape_cast %315 : vector<8xf32> to vector<8x1xf32>
    %317 = vector.extract_strided_slice %200 {offsets = [0, 160], sizes = [8, 16], strides = [1, 1]} : vector<8x256xf32> to vector<8x16xf32>
    %318 = arith.maximumf %314, %317 : vector<8x16xf32>
    %cst_95 = arith.constant dense<0xFF800000> : vector<8xf32>
    %319 = vector.multi_reduction <maximumf>, %317, %cst_95 [1] : vector<8x16xf32> to vector<8xf32>
    %320 = vector.shape_cast %319 : vector<8xf32> to vector<8x1xf32>
    %321 = vector.extract_strided_slice %200 {offsets = [0, 176], sizes = [8, 16], strides = [1, 1]} : vector<8x256xf32> to vector<8x16xf32>
    %322 = arith.maximumf %318, %321 : vector<8x16xf32>
    %cst_96 = arith.constant dense<0xFF800000> : vector<8xf32>
    %323 = vector.multi_reduction <maximumf>, %321, %cst_96 [1] : vector<8x16xf32> to vector<8xf32>
    %324 = vector.shape_cast %323 : vector<8xf32> to vector<8x1xf32>
    %325 = vector.extract_strided_slice %200 {offsets = [0, 192], sizes = [8, 16], strides = [1, 1]} : vector<8x256xf32> to vector<8x16xf32>
    %326 = arith.maximumf %322, %325 : vector<8x16xf32>
    %cst_97 = arith.constant dense<0xFF800000> : vector<8xf32>
    %327 = vector.multi_reduction <maximumf>, %325, %cst_97 [1] : vector<8x16xf32> to vector<8xf32>
    %328 = vector.shape_cast %327 : vector<8xf32> to vector<8x1xf32>
    %329 = vector.extract_strided_slice %200 {offsets = [0, 208], sizes = [8, 16], strides = [1, 1]} : vector<8x256xf32> to vector<8x16xf32>
    %330 = arith.maximumf %326, %329 : vector<8x16xf32>
    %cst_98 = arith.constant dense<0xFF800000> : vector<8xf32>
    %331 = vector.multi_reduction <maximumf>, %329, %cst_98 [1] : vector<8x16xf32> to vector<8xf32>
    %332 = vector.shape_cast %331 : vector<8xf32> to vector<8x1xf32>
    %333 = vector.extract_strided_slice %200 {offsets = [0, 224], sizes = [8, 16], strides = [1, 1]} : vector<8x256xf32> to vector<8x16xf32>
    %334 = arith.maximumf %330, %333 : vector<8x16xf32>
    %cst_99 = arith.constant dense<0xFF800000> : vector<8xf32>
    %335 = vector.multi_reduction <maximumf>, %333, %cst_99 [1] : vector<8x16xf32> to vector<8xf32>
    %336 = vector.shape_cast %335 : vector<8xf32> to vector<8x1xf32>
    %337 = vector.extract_strided_slice %200 {offsets = [0, 240], sizes = [8, 16], strides = [1, 1]} : vector<8x256xf32> to vector<8x16xf32>
    %338 = arith.maximumf %334, %337 : vector<8x16xf32>
    %cst_100 = arith.constant dense<0xFF800000> : vector<8xf32>
    %339 = vector.multi_reduction <maximumf>, %337, %cst_100 [1] : vector<8x16xf32> to vector<8xf32>
    %340 = vector.shape_cast %339 : vector<8xf32> to vector<8x1xf32>
    %341 = tpu.concatenate %280, %284, %288, %292, %296, %300, %304, %308, %312, %316, %320, %324, %328, %332, %336, %340 in 1 : vector<8x1xf32>, vector<8x1xf32>, vector<8x1xf32>, vector<8x1xf32>, vector<8x1xf32>, vector<8x1xf32>, vector<8x1xf32>, vector<8x1xf32>, vector<8x1xf32>, vector<8x1xf32>, vector<8x1xf32>, vector<8x1xf32>, vector<8x1xf32>, vector<8x1xf32>, vector<8x1xf32>, vector<8x1xf32> -> vector<8x16xf32>
    %cst_101 = arith.constant dense<0.000000e+00> : vector<8x16xf32>
    %342 = tpu.matmul %200, %4, %cst_101 {dimension_numbers = #tpu.dot_dimension_numbers<[1], [0], [0], [1], [0, 0, 1, 1], [], []>} : vector<8x256xf32>, vector<256x16xf32>, vector<8x16xf32> -> vector<8x16xf32>
    %cst_102 = arith.constant dense<0.000000e+00> : vector<8x16xf32>
    %343 = tpu.matmul %200, %6, %cst_102 {dimension_numbers = #tpu.dot_dimension_numbers<[1], [0], [0], [1], [0, 0, 1, 1], [], []>} : vector<8x256xf32>, vector<256x16xf32>, vector<8x16xf32> -> vector<8x16xf32>
    %cst_103 = arith.constant dense<0.000000e+00> : vector<8x16xf32>
    %344 = tpu.matmul %0, %338, %cst_103 {dimension_numbers = #tpu.dot_dimension_numbers<[1], [0], [0], [1], [0, 0, 1, 1], [], []>} : vector<8x8xf32>, vector<8x16xf32>, vector<8x16xf32> -> vector<8x16xf32>
    %cst_104 = arith.constant dense<0.000000e+00> : vector<8x16xf32>
    %345 = tpu.matmul %1, %342, %cst_104 {dimension_numbers = #tpu.dot_dimension_numbers<[1], [0], [0], [1], [0, 0, 1, 1], [], []>} : vector<8x8xf32>, vector<8x16xf32>, vector<8x16xf32> -> vector<8x16xf32>
    %346 = arith.addf %344, %345 : vector<8x16xf32>
    %347 = vector.broadcast %9 : f32 to vector<8x16xf32>
    %348 = arith.addf %346, %347 : vector<8x16xf32>
    %cst_105 = arith.constant 0.000000e+00 : f32
    %349 = vector.broadcast %cst_105 : f32 to vector<8x16xf32>
    %350 = arith.subf %349, %348 : vector<8x16xf32>
    %351 = math.exp %350 : vector<8x16xf32>
    %cst_106 = arith.constant 1.000000e+00 : f32
    %352 = vector.broadcast %cst_106 : f32 to vector<8x16xf32>
    %353 = arith.addf %352, %351 : vector<8x16xf32>
    %354 = tpu.reciprocal %353 : vector<8x16xf32> -> vector<8x16xf32>
    %cst_107 = arith.constant dense<0.000000e+00> : vector<8x16xf32>
    %355 = tpu.matmul %341, %2, %cst_107 {dimension_numbers = #tpu.dot_dimension_numbers<[1], [0], [0], [1], [0, 0, 1, 1], [], []>} : vector<8x16xf32>, vector<16x16xf32>, vector<8x16xf32> -> vector<8x16xf32>
    %cst_108 = arith.constant dense<0.000000e+00> : vector<8x16xf32>
    %356 = tpu.matmul %343, %3, %cst_108 {dimension_numbers = #tpu.dot_dimension_numbers<[1], [0], [0], [1], [0, 0, 1, 1], [], []>} : vector<8x16xf32>, vector<16x16xf32>, vector<8x16xf32> -> vector<8x16xf32>
    %357 = arith.addf %355, %356 : vector<8x16xf32>
    %358 = vector.broadcast %10 : f32 to vector<8x16xf32>
    %359 = arith.addf %357, %358 : vector<8x16xf32>
    %cst_109 = arith.constant 0.000000e+00 : f32
    %360 = vector.broadcast %cst_109 : f32 to vector<8x16xf32>
    %361 = arith.subf %360, %359 : vector<8x16xf32>
    %362 = math.exp %361 : vector<8x16xf32>
    %cst_110 = arith.constant 1.000000e+00 : f32
    %363 = vector.broadcast %cst_110 : f32 to vector<8x16xf32>
    %364 = arith.addf %363, %362 : vector<8x16xf32>
    %365 = tpu.reciprocal %364 : vector<8x16xf32> -> vector<8x16xf32>
    %366 = vector.broadcast %11 : f32 to vector<1x256xf32>
    %367 = arith.mulf %366, %277 : vector<1x256xf32>
    %368 = vector.broadcast %12 : f32 to vector<8x16xf32>
    %369 = arith.mulf %368, %354 : vector<8x16xf32>
    %cst_111 = arith.constant dense<0.000000e+00> : vector<8x256xf32>
    %370 = tpu.matmul %369, %5, %cst_111 {dimension_numbers = #tpu.dot_dimension_numbers<[1], [0], [0], [1], [0, 0, 1, 1], [], []>} : vector<8x16xf32>, vector<16x256xf32>, vector<8x256xf32> -> vector<8x256xf32>
    %371 = vector.broadcast %367 : vector<1x256xf32> to vector<8x256xf32>
    %372 = arith.addf %371, %370 : vector<8x256xf32>
    %373 = vector.broadcast %13 : f32 to vector<8x16xf32>
    %374 = arith.mulf %373, %365 : vector<8x16xf32>
    %cst_112 = arith.constant dense<0.000000e+00> : vector<8x256xf32>
    %375 = tpu.matmul %374, %7, %cst_112 {dimension_numbers = #tpu.dot_dimension_numbers<[1], [0], [0], [1], [0, 0, 1, 1], [], []>} : vector<8x16xf32>, vector<16x256xf32>, vector<8x256xf32> -> vector<8x256xf32>
    %376 = arith.addf %372, %375 : vector<8x256xf32>
    %377 = arith.mulf %200, %376 : vector<8x256xf32>
    %378 = arith.index_cast %c1_i32 : i32 to index
    %c0_113 = arith.constant 0 : index
    %c0_114 = arith.constant 0 : index
    %379 = vector.load %arg11[%378, %c0_113, %c0_114] : memref<2x8x256xf32, #tpu.memory_space<vmem>>, vector<1x8x256xf32>
    %380 = vector.shape_cast %379 : vector<1x8x256xf32> to vector<8x256xf32>
    %381 = vector.shape_cast %377 : vector<8x256xf32> to vector<1x8x256xf32>
    tpu.vector_store %arg11[%378, %c0_113, %c0_114], %381 {strides = array<i32>} : memref<2x8x256xf32, #tpu.memory_space<vmem>>, vector<1x8x256xf32>,
    %c2_i32 = arith.constant 2 : i32
    return
  }
  func.func @transform_0(%arg0: i32) -> i32 {
    %c0_i32 = arith.constant 0 : i32
    %c0_i32_0 = arith.constant 0 : i32
    return %c0_i32 : i32
  }
  func.func @transform_1(%arg0: i32) -> (i32, i32, i32) {
    %c0_i32 = arith.constant 0 : i32
    %c0_i32_0 = arith.constant 0 : i32
    %c0_i32_1 = arith.constant 0 : i32
    return %arg0, %c0_i32, %c0_i32_0 : i32, i32, i32
  }
  func.func @transform_2(%arg0: i32) -> (i32, i32) {
    %c0_i32 = arith.constant 0 : i32
    %c0_i32_0 = arith.constant 0 : i32
    %c0_i32_1 = arith.constant 0 : i32
    return %c0_i32, %c0_i32_0 : i32, i32
  }
  func.func @transform_3(%arg0: i32) -> (i32, i32) {
    %c0_i32 = arith.constant 0 : i32
    %c0_i32_0 = arith.constant 0 : i32
    %c0_i32_1 = arith.constant 0 : i32
    return %c0_i32, %c0_i32_0 : i32, i32
  }
  func.func @transform_4(%arg0: i32) -> (i32, i32) {
    %c0_i32 = arith.constant 0 : i32
    %c0_i32_0 = arith.constant 0 : i32
    %c0_i32_1 = arith.constant 0 : i32
    return %c0_i32, %c0_i32_0 : i32, i32
  }
  func.func @transform_5(%arg0: i32) -> (i32, i32) {
    %c0_i32 = arith.constant 0 : i32
    %c0_i32_0 = arith.constant 0 : i32
    %c0_i32_1 = arith.constant 0 : i32
    return %c0_i32, %c0_i32_0 : i32, i32
  }
  func.func @transform_6(%arg0: i32) -> (i32, i32) {
    %c0_i32 = arith.constant 0 : i32
    %c0_i32_0 = arith.constant 0 : i32
    %c0_i32_1 = arith.constant 0 : i32
    return %c0_i32, %c0_i32_0 : i32, i32
  }
  func.func @transform_7(%arg0: i32) -> (i32, i32) {
    %c0_i32 = arith.constant 0 : i32
    %c0_i32_0 = arith.constant 0 : i32
    %c0_i32_1 = arith.constant 0 : i32
    return %c0_i32, %c0_i32_0 : i32, i32
  }
  func.func @transform_8(%arg0: i32) -> (i32, i32) {
    %c0_i32 = arith.constant 0 : i32
    %c0_i32_0 = arith.constant 0 : i32
    %c0_i32_1 = arith.constant 0 : i32
    return %c0_i32, %c0_i32_0 : i32, i32
  }
  func.func @transform_9(%arg0: i32) -> (i32, i32) {
    %c0_i32 = arith.constant 0 : i32
    %c0_i32_0 = arith.constant 0 : i32
    %c0_i32_1 = arith.constant 0 : i32
    return %c0_i32, %c0_i32_0 : i32, i32
  }
  func.func @transform_10(%arg0: i32) -> (i32, i32, i32) {
    %c0_i32 = arith.constant 0 : i32
    %c0_i32_0 = arith.constant 0 : i32
    %c0_i32_1 = arith.constant 0 : i32
    return %arg0, %c0_i32, %c0_i32_0 : i32, i32, i32
  }
}

</mosaic_0001>

<bundles_post_ra>
// kernel: tpu_custom_call.1
= control target key start
LH: loop header
LB: loop body
LE: loop exit
PB: predicated region body
PF: predicated region fallthrough
CT: control target
= control target key end

     0   :  { %15 = vsyncpa [#allocation4], 0  ;;  %s2697_s0 = inlined_call_operand.vmem [shape: f32[16], index: 0, kind: input, shape index: {}]   ;;  %s2698_s1 = inlined_call_operand.vmem [shape: f32[2,8,256], index: 1, kind: input, shape index: {}]   ;;  %s2699_s2 = inlined_call_operand.vmem [shape: f32[8,8], index: 2, kind: input, shape index: {}]   ;;  %s2700_s3 = inlined_call_operand.vmem [shape: f32[8,8], index: 3, kind: input, shape index: {}]   ;;  %s2701_s4 = inlined_call_operand.vmem [shape: f32[16,16], index: 4, kind: input, shape index: {}]   ;;  %s2702_s5 = inlined_call_operand.vmem [shape: f32[16,16], index: 5, kind: input, shape index: {}]   ;;  %s2703_s6 = inlined_call_operand.vmem [shape: f32[256,16], index: 6, kind: input, shape index: {}]   ;;  %s2704_s7 = inlined_call_operand.vmem [shape: f32[16,256], index: 7, kind: input, shape index: {}]   ;;  %s2705_s8 = inlined_call_operand.vmem [shape: f32[256,16], index: 8, kind: input, shape index: {}]   ;;  %s2706_s9 = inlined_call_operand.vmem [shape: f32[16,256], index: 9, kind: input, shape index: {}]   ;;  %s2707_s10 = inlined_call_operand.hbm [shape: f32[2,8,256], index: 10, kind: output, shape index: {}]  }
   0x1   :  { %16 = vsyncpa [#allocation3], 0  ;;  %s22_s15 = sshll.u32 %s2697_s0, 4  ;;  %s1567_s16 = smov [#allocation2]   ;;  %s23_s15 = int_to_ptr.vmem [resolvable:$true] %s22_s15 }
   0x2   :  { %25 = dma.vmem_to_smem %s23_s15, 16, %s1567_s16, [#allocation4]  }
   0x3   :  { %1563 = dma.done.wait [#allocation4], 16  }
   0x4   :  { %1564 = vsyncadd [#allocation4], 4294967280 }
   0x5   :  { %48 = sfence }
   0x6   :  { %v1638_v0 = vld [vmem:[%s2698_s1] sm:$0xff]  ;;  %v1643_v1 = vld [vmem:[%s2698_s1 + $0x8] sm:$0xff]  ;;  %s1568_s0 = smov 32   ;;  %s1569_s21 = smov 16   ;;  %vm2762_vm0 = vcmask 261248   ;;  %vm197_vm1 = vcmask 130048  }
   0x7   :  { %v135_v2 = vrot.slane %v1638_v0, 4  ;;  %v141_v3 = vrot.slane %v1643_v1, 4  ;;  %s1570_s22 = smov 112   ;;  %s1571_s23 = smov 96   ;;  %v339_v24 = vsel %vm2762_vm0, %v1638_v0, -inf  ;;  %v330_v25 = vsel %vm197_vm1, %v1638_v0, -inf }
   0x8   :  { %vm354_vm2 = vcmask 523648   ;;  %vm362_vm3 = vcmask 654848   ;;  %vm346_vm4 = vcmask 392448   ;;  %vm370_vm5 = vcmask 786048   ;;  %s1434_s24 = sld [smem:[#allocation2 + $0xb]]  ;;  %v1719_v37 = vld [vmem:[%s2705_s8 + $0x78] sm:$0xff] }
   0x9   :  { %v148_v4 = vadd.f32 %v135_v2, %v1638_v0  ;;  %v136_v5 = vmax.f32 %v1638_v0, %v135_v2  ;;  %v154_v6 = vadd.f32 %v141_v3, %v1643_v1  ;;  %v142_v7 = vmax.f32 %v1643_v1, %v141_v3  ;;  %s1433_s25 = sld [smem:[#allocation2 + $0x6]]  ;;  %v1724_v38 = vld [vmem:[%s2705_s8 + $0xf8] sm:$0xff]  ;;  %514 = vmatpush.msra.mxu2 %v1719_v37  ;;  %v1737_v43 = vld [vmem:[%s2705_s8 + $0x70] sm:$0xff]  ;;  %s1572_s15 = smov 80   ;;  %v1757_v51 = vld [vmem:[%s2705_s8 + $0x68] sm:$0xff] }
   0xa   :  { %v355_v26 = vsel %vm354_vm2, %v1638_v0, -inf  ;;  %v363_v27 = vsel %vm362_vm3, %v1638_v0, -inf  ;;  %v347_v28 = vsel %vm346_vm4, %v1638_v0, -inf  ;;  %vm378_vm6 = vcmask 917248   ;;  %s1435_s26 = sld [smem:[#allocation2 + $0x7]]  ;;  %534 = vmatpush.msra.mxu3 %v1724_v38  ;;  %v1742_v44 = vld [vmem:[%s2705_s8 + $0xf0] sm:$0xff] }
   0xb   :  { %v149_v8 = vrot.slane %v148_v4, 2  ;;  %v137_v9 = vrot.slane %v136_v5, 2  ;;  %v155_v10 = vrot.slane %v154_v6, 2  ;;  %v143_v11 = vrot.slane %v142_v7, 2  ;;  %515 = vmatpush.msra.mxu2 %v1737_v43  ;;  %v1762_v52 = vld [vmem:[%s2705_s8 + $0xe8] sm:$0xff]  ;;  %v1770_v54 = vld [vmem:[%s2705_s8 + $0x60] sm:$0xff] }
   0xc   :  { %v371_v29 = vsel %vm370_vm5, %v1638_v0, -inf  ;;  %v379_v30 = vsel %vm378_vm6, %v1638_v0, -inf  ;;  %vm386_vm7 = vcmask 1048448   ;;  %v391_v33 = vsel %vm197_vm1, %v1643_v1, -inf  ;;  %535 = vmatpush.msra.mxu3 %v1742_v44  ;;  %v1775_v55 = vld [vmem:[%s2705_s8 + $0xe0] sm:$0xff]  ;;  %v1781_v58 = vld [vmem:[%s2705_s8 + $0x58] sm:$0xff] }
   0xd   :  { %v150_v12 = vadd.f32 %v149_v8, %v148_v4  ;;  %v138_v13 = vmax.f32 %v136_v5, %v137_v9  ;;  %v156_v16 = vadd.f32 %v155_v10, %v154_v6  ;;  %v144_v17 = vmax.f32 %v142_v7, %v143_v11  ;;  %516 = vmatpush.msra.mxu2 %v1757_v51  ;;  %v1786_v59 = vld [vmem:[%s2705_s8 + $0xd8] sm:$0xff]  ;;  %s1794_s11 = sld [smem:[#allocation2 + $0xc]]  ;;  %v1804_v3 = vld [vmem:[%s2705_s8 + $0x50] sm:$0xff]  ;;  %v1819_v8 = vld [vmem:[%s2705_s8 + $0x48] sm:$0xff]  ;;  %s1573_s30 = smov 64  }
   0xe   :  { %v387_v32 = vsel %vm386_vm7, %v1638_v0, -inf  ;;  %v399_v36 = vsel %vm2762_vm0, %v1643_v1, -inf  ;;  %vm166_vm8 = vcmask 261120   ;;  %v406_v39 = vsel %vm346_vm4, %v1643_v1, -inf  ;;  %536 = vmatpush.msra.mxu3 %v1762_v52  ;;  %s1796_s12 = sld [smem:[#allocation2 + $0x8]]  ;;  %v1809_v4 = vld [vmem:[%s2705_s8 + $0xd0] sm:$0xff] }
   0xf   :  { %v151_v14 = vrot.slane %v150_v12, 1  ;;  %v139_v15 = vrot.slane %v138_v13, 1  ;;  %v157_v20 = vrot.slane %v156_v16, 1  ;;  %v145_v21 = vrot.slane %v144_v17, 1  ;;  %517 = vmatpush.msra.mxu2 %v1770_v54  ;;  %v1824_v9 = vld [vmem:[%s2705_s8 + $0xc8] sm:$0xff]  ;;  %s1866_s18 = sld [smem:[#allocation2 + $0x9]] }
  0x10   :  { %v1730_v40 = vstv %s1434_s24  ;;  %v1732_v42 = vstv %s1433_s25  ;;  %v1747_v47 = vstv %s1435_s26  ;;  %v413_v60 = vsel %vm354_vm2, %v1643_v1, -inf  ;;  %537 = vmatpush.msra.mxu3 %v1775_v55  ;;  %s1828_s25 = sld [smem:[#allocation2 + $0xd]]  ;;  %s1574_s20 = smov 48  }
  0x11   :  { %v1651_v18 = vadd.f32 %v151_v14, %v150_v12  ;;  %v1653_v19 = vmax.f32 %v138_v13, %v139_v15  ;;  %v1661_v22 = vadd.f32 %v157_v20, %v156_v16  ;;  %v1663_v23 = vmax.f32 %v144_v17, %v145_v21  ;;  %518 = vmatpush.msra.mxu2 %v1781_v58  ;;  %v1837_v13 = vld [vmem:[%s2705_s8 + $0x40] sm:$0xff]  ;;  %v1853_v17 = vld [vmem:[%s2705_s8 + $0x38] sm:$0xff]  ;;  %s2574_s13 = sld [smem:[#allocation2 + $0x5]] }
  0x12   :  { %538 = vmatpush.msra.mxu3 %v1786_v59  ;;  %v1842_v14 = vld [vmem:[%s2705_s8 + $0xc0] sm:$0xff]  ;;  %v427_v15 = vsel %vm370_vm5, %v1643_v1, -inf  ;;  %v1858_v20 = vld [vmem:[%s2705_s8 + $0xb8] sm:$0xff]  ;;  %vm2761_vm9 = vcmask 916480   ;;  %vm2753_vm10 = vcmask 785408   ;;  %vm2754_vm11 = vcmask 7168  }
  0x13   :  { %179 = vrot.lane.b32.xlu1 %v1651_v18, %s1568_s0  ;;  %193 = vrot.lane.b32.xlu2 %v1653_v19, %s1569_s21  ;;  %vm2757_vm12 = vcmask 15360   ;;  %vm2755_vm13 = vcmask 23552   ;;  %vm2756_vm14 = vcmask 31744   ;;  %vm2758_vm15 = vcmask 39936   ;;  %s2620_s14 = sld [smem:[#allocation2 + $0x4]] }
  0x14   :  { %162 = vrot.lane.b32.xlu0 %v1653_v19, %s1568_s0  ;;  %519 = vmatpush.msra.mxu2 %v1804_v3 }
  0x15   :  { %539 = vmatpush.msra.mxu3 %v1809_v4 }
  0x16   :  { %520 = vmatpush.msra.mxu2 %v1819_v8 }
  0x17   :  { %540 = vmatpush.msra.mxu3 %v1824_v9 }
  0x18   :  { %521 = vmatpush.msra.mxu2 %v1837_v13 }
  0x19   :  { %541 = vmatpush.msra.mxu3 %v1842_v14 }
  0x1a   :  { %522 = vmatpush.msra.mxu2 %v1853_v17 }
  0x1b   :  { %181 = vrot.lane.b32.xlu1 %v1661_v22, %s1568_s0  ;;  %195 = vrot.lane.b32.xlu2 %v1663_v23, %s1569_s21 }
  0x1c   :  { %164 = vrot.lane.b32.xlu0 %v1663_v23, %s1568_s0  ;;  %542 = vmatpush.msra.mxu3 %v1858_v20 }
  0x23   :  { %210 = vrot.lane.b32.xlu1 %v1661_v22, %s1569_s21  ;;  %234 = vrot.lane.b32.xlu2 %v1653_v19, %s1570_s22 }
  0x24   :  { %208 = vrot.lane.b32.xlu0 %v1651_v18, %s1569_s21 }
  0x2b   :  { %249 = vrot.lane.b32.xlu1 %v1651_v18, %s1570_s22  ;;  %251 = vrot.lane.b32.xlu2 %v1661_v22, %s1570_s22 }
  0x2c   :  { %236 = vrot.lane.b32.xlu0 %v1663_v23, %s1570_s22 }
  0x33   :  { %265 = vrot.lane.b32.xlu1 %v1663_v23, %s1571_s23  ;;  %278 = vrot.lane.b32.xlu2 %v1651_v18, %s1571_s23 }
  0x34   :  { %263 = vrot.lane.b32.xlu0 %v1653_v19, %s1571_s23 }
  0x3c   :  { %280 = vrot.lane.b32.xlu0 %v1661_v22, %s1571_s23 }
  0x5c   :  { %340 = vmax.xlane.f32.xlu2 %v339_v24  ;;  %v1861_v24 = vstv %s1794_s11  ;;  %s1882_s11 = sld [smem:[#allocation2 + $0xe]] }
  0x5d   :  { %331 = vmax.xlane.f32.xlu1 %v330_v25  ;;  %v1864_v25 = vstv %s1796_s12 }
  0x64   :  { %356 = vmax.xlane.f32.xlu2 %v355_v26 }
  0x65   :  { %364 = vmax.xlane.f32.xlu1 %v363_v27  ;;  %v1873_v27 = vld [vmem:[%s2705_s8 + $0x30] sm:$0xff] }
  0x66   :  { %348 = vmax.xlane.f32.xlu0 %v347_v28  ;;  %v1878_v28 = vld [vmem:[%s2705_s8 + $0xb0] sm:$0xff]  ;;  %523 = vmatpush.msra.mxu2 %v1873_v27 }
  0x67   :  { %543 = vmatpush.msra.mxu3 %v1878_v28 }
  0x6c   :  { %372 = vmax.xlane.f32.xlu2 %v371_v29 }
  0x6d   :  { %v194_v31 = vpop.permute.xlu2 %193 }
  0x6e   :  { %380 = vmax.xlane.f32.xlu0 %v379_v30  ;;  %v201_v48 = vsel %vm197_vm1, 0.0, %v194_v31 }
  0x6f   :  { %v203_v56 = vmul.f32 %v1747_v47, %v201_v48 }
  0x74   :  { %388 = vmax.xlane.f32.xlu2 %v387_v32 }
  0x75   :  { %v196_v34 = vpop.permute.xlu2 %195 }
  0x76   :  { %392 = vmax.xlane.f32.xlu0 %v391_v33  ;;  %v1710_v35 = vsel %vm197_vm1, %v194_v31, %v196_v34  ;;  %v224_v31 = vmul.f32 %v1864_v25, %v1663_v23  ;;  %v223_v34 = vmul.f32 %v1864_v25, %v1653_v19  ;;  %v1910_v19 = vld [vmem:[%s2705_s8 + $0x20] sm:$0xff] }
  0x77   :  { %v204_v11 = vmul.f32 %v1747_v47, %v1710_v35  ;;  %v1895_v35 = vld [vmem:[%s2705_s8 + $0x28] sm:$0xff] }
  0x78   :  { %524 = vmatpush.msra.mxu2 %v1895_v35 }
  0x7a   :  { %525 = vmatpush.msra.mxu2 %v1910_v19 }
  0x7d   :  { %v1826_v10 = vpop.permute.xlu2 %234 }
  0x7e   :  { %400 = vmax.xlane.f32.xlu0 %v399_v36  ;;  %334 = vrot.lane.b32.xlu1 %v1638_v0, %s1570_s22  ;;  %v1900_v36 = vld [vmem:[%s2705_s8 + $0xa8] sm:$0xff] }
  0x7f   :  { %544 = vmatpush.msra.mxu3 %v1900_v36 }
  0x85   :  { %v180_v41 = vpop.permute.xlu1 %179 }
  0x86   :  { %v186_v45 = vsel %vm166_vm8, 0.0, %v180_v41  ;;  %407 = vmax.xlane.f32.xlu0 %v406_v39  ;;  %v163_v46 = vpop.permute.xlu0 %162  ;;  %350 = vrot.lane.b32.xlu1 %v1638_v0, %s1572_s15  ;;  %v1903_v39 = vstv %s1828_s25  ;;  %s1923_s25 = sld [smem:[#allocation2 + $0xa]] }
  0x87   :  { %v188_v49 = vmul.f32 %v1730_v40, %v186_v45  ;;  %v170_v50 = vsel %vm166_vm8, 0.0, %v163_v46  ;;  %v1915_v45 = vld [vmem:[%s2705_s8 + $0xa0] sm:$0xff] }
  0x88   :  { %v172_v53 = vmul.f32 %v1732_v42, %v170_v50  ;;  %2763 = vst [vmem:[#allocation8_spill] sm:$0xff] %v1915_v45  ;;  %545 = vmatpush.msra.mxu3 %v1915_v45  ;;  %v229_v50 = vmul.f32 %v1903_v39, %v1651_v18 }
  0x8a   :  { %v190_v57 = vadd.f32 %v188_v49, %v172_v53  ;;  %v230_v53 = vmul.f32 %v1903_v39, %v1661_v22 }
  0x8c   :  { %342 = vrot.lane.b32.xlu2 %v1638_v0, %s1571_s23  ;;  %v205_v61 = vadd.f32 %v203_v56, %v190_v57  ;;  %v1928_v56 = vld [vmem:[%s2705_s8 + $0x18] sm:$0xff] }
  0x8d   :  { %v182_v62 = vpop.permute.xlu1 %181  ;;  %2764 = vst [vmem:[#allocation9_spill] sm:$0xff] %v1928_v56  ;;  %v1933_v57 = vld [vmem:[%s2705_s8 + $0x98] sm:$0xff]  ;;  %526 = vmatpush.msra.mxu2 %v1928_v56 }
  0x8e   :  { %v183_v63 = vsel %vm166_vm8, %v180_v41, %v182_v62  ;;  %414 = vmax.xlane.f32.xlu0 %v413_v60  ;;  %v165_v2 = vpop.permute.xlu0 %164  ;;  %2765 = vst [vmem:[#allocation10_spill] sm:$0xff] %v1933_v57  ;;  %546 = vmatpush.msra.mxu3 %v1933_v57  ;;  %v1944_v62 = vld [vmem:[%s2705_s8 + $0x10] sm:$0xff] }
  0x8f   :  { %v189_v5 = vmul.f32 %v1730_v40, %v183_v63  ;;  %v167_v6 = vsel %vm166_vm8, %v163_v46, %v165_v2  ;;  %v252_v46 = vpop.permute.xlu2 %251  ;;  %2766 = vst [vmem:[#allocation11_spill] sm:$0xff] %v1944_v62  ;;  %v1949_v63 = vld [vmem:[%s2705_s8 + $0x90] sm:$0xff]  ;;  %v1952_v2 = vstv %s1882_s11  ;;  %527 = vmatpush.msra.mxu2 %v1944_v62 }
  0x90   :  { %v173_v7 = vmul.f32 %v1732_v42, %v167_v6  ;;  %2767 = vst [vmem:[#allocation12_spill] sm:$0xff] %v1949_v63  ;;  %547 = vmatpush.msra.mxu3 %v1949_v63 }
  0x92   :  { %v191_v12 = vadd.f32 %v189_v5, %v173_v7  ;;  %v256_v5 = vsel %vm2761_vm9, %v252_v46, 0.0 }
  0x94   :  { %358 = vrot.lane.b32.xlu2 %v1638_v0, %s1573_s30  ;;  %v206_v16 = vadd.f32 %v204_v11, %v191_v12 }
  0x95   :  { %v211_v21 = vpop.permute.xlu1 %210 }
  0x96   :  { %428 = vmax.xlane.f32.xlu0 %v427_v15  ;;  %v209_v26 = vpop.permute.xlu0 %208 }
  0x97   :  { %v212_v29 = vsel %vm197_vm1, %v209_v26, %v211_v21  ;;  %v215_v30 = vsel %vm197_vm1, 0.0, %v209_v26  ;;  %v1965_v21 = vld [vmem:[%s2705_s8 + $0x8] sm:$0xff]  ;;  %v259_v26 = vmul.f32 %v1952_v2, %v256_v5 }
  0x98   :  { %v217_v32 = vmul.f32 %v1861_v24, %v215_v30  ;;  %v218_v33 = vmul.f32 %v1861_v24, %v212_v29  ;;  %2768 = vst [vmem:[#allocation13_spill] sm:$0xff] %v1965_v21  ;;  %528 = vmatpush.msra.mxu2 %v1965_v21 }
  0x9a   :  { %v219_v23 = vadd.f32 %v217_v32, %v205_v61  ;;  %v220_v41 = vadd.f32 %v218_v33, %v206_v16  ;;  %v1936_v61 = vstv %s1866_s18  ;;  %v1979_v32 = vld [vmem:[%s2705_s8] sm:$0xff] }
  0x9b   :  { %2770 = vst [vmem:[#allocation15_spill] sm:$0xff] %v1979_v32  ;;  %v1984_v33 = vld [vmem:[%s2705_s8 + $0x80] sm:$0xff]  ;;  %529 = vmatpush.msra.mxu2 %v1979_v32 }
  0x9c   :  { %v225_v48 = vadd.f32 %v223_v34, %v219_v23  ;;  %v226_v49 = vadd.f32 %v224_v31, %v220_v41  ;;  %2771 = vst [vmem:[#allocation16_spill] sm:$0xff] %v1984_v33  ;;  %v1989_v34 = vstv %s1923_s25  ;;  %530 = vmatmul.f32.vlgmr.msra.gmra.mxu2 %v1638_v0  ;;  %s1442_s25 = sld [smem:[#allocation2 + $0xf]] }
  0x9d   :  { %v250_v60 = vpop.permute.xlu1 %249 }
  0x9e   :  { %v253_v18 = vsel %vm2761_vm9, %v250_v60, %v252_v46  ;;  %v237_v22 = vpop.permute.xlu0 %236  ;;  %v232_v11 = vadd.f32 %v230_v53, %v226_v49  ;;  %v231_v12 = vadd.f32 %v229_v50, %v225_v48  ;;  %v1996_v46 = vld [vmem:[%s2703_s6 + $0x78] sm:$0xff]  ;;  %v2006_v49 = vld [vmem:[%s2703_s6 + $0x70] sm:$0xff] }
  0x9f   :  { %v239_v6 = vsel %vm2761_vm9, %v1826_v10, %v237_v22  ;;  %v242_v7 = vsel %vm2761_vm9, %v237_v22, 0.0  ;;  %v1970_v10 = vld [vmem:[%s2705_s8 + $0x88] sm:$0xff]  ;;  %v258_v29 = vmul.f32 %v1952_v2, %v253_v18  ;;  %2772 = vst [vmem:[#allocation17_spill] sm:$0xff] %v1996_v46  ;;  %v2001_v48 = vld [vmem:[%s2703_s6 + $0xf8] sm:$0xff]  ;;  %474 = vmatpush.msra.mxu0 %v1996_v46  ;;  %v2013_v53 = vld [vmem:[%s2703_s6 + $0xf0] sm:$0xff]  ;;  %vm470_vm9 = vcmask 113664  }
  0xa0   :  { %v244_v15 = vmul.f32 %v1936_v61, %v239_v6  ;;  %v245_v16 = vmul.f32 %v1936_v61, %v242_v7  ;;  %2769 = vst [vmem:[#allocation14_spill] sm:$0xff] %v1970_v10  ;;  %548 = vmatpush.msra.mxu3 %v1970_v10  ;;  %494 = vmatpush.msra.mxu1 %v2001_v48  ;;  %s1576_s8 = smov 256  }
  0xa1   :  { %2773 = vst [vmem:[#allocation18_spill] sm:$0xff] %v2001_v48  ;;  %475 = vmatpush.msra.mxu0 %v2006_v49 }
  0xa2   :  { %v246_v30 = vadd.f32 %v244_v15, %v231_v12  ;;  %v247_v31 = vadd.f32 %v245_v16, %v232_v11  ;;  %549 = vmatpush.msra.mxu3 %v1984_v33  ;;  %2774 = vst [vmem:[#allocation19_spill] sm:$0xff] %v2006_v49  ;;  %495 = vmatpush.msra.mxu1 %v2013_v53  ;;  %v2024_v11 = vld [vmem:[%s2703_s6 + $0x68] sm:$0xff]  ;;  %v2034_v15 = vld [vmem:[%s2703_s6 + $0x60] sm:$0xff] }
  0xa3   :  { %550 = vmatmul.f32.vlgmr.msra.gmra.mxu3 %v1643_v1  ;;  %2775 = vst [vmem:[#allocation20_spill] sm:$0xff] %v2013_v53  ;;  %v2029_v12 = vld [vmem:[%s2703_s6 + $0xe8] sm:$0xff]  ;;  %476 = vmatpush.msra.mxu0 %v2024_v11  ;;  %v2307_v49 = vld [vmem:[%s2701_s4] sm:$0xff] }
  0xa4   :  { %v261_v23 = vadd.f32 %v259_v26, %v247_v31  ;;  %v260_v41 = vadd.f32 %v258_v29, %v246_v30  ;;  %2776 = vst [vmem:[#allocation21_spill] sm:$0xff] %v2024_v11  ;;  %v2042_v26 = vld [vmem:[%s2703_s6 + $0xe0] sm:$0xff]  ;;  %496 = vmatpush.msra.mxu1 %v2029_v12  ;;  %v2048_v29 = vld [vmem:[%s2703_s6 + $0x58] sm:$0xff]  ;;  %v2056_v31 = vstv %s1442_s25  ;;  %v2295_v11 = vld [vmem:[%s2701_s4 + $0x8] sm:$0xff] }
  0xa5   :  { %v266_v50 = vpop.permute.xlu1 %265  ;;  %2777 = vst [vmem:[#allocation22_spill] sm:$0xff] %v2029_v12  ;;  %477 = vmatpush.msra.mxu0 %v2034_v15  ;;  %v2054_v30 = vld [vmem:[%s2703_s6 + $0xd8] sm:$0xff]  ;;  %v2290_v12 = vld [vmem:[%s2702_s5 + $0x8] sm:$0xff]  ;;  %660 = vmatpush.msrb.mxu3 %v2295_v11 }
  0xa6   :  { %v271_v60 = vsel %vm2753_vm10, %v266_v50, 0.0  ;;  %v264_v18 = vpop.permute.xlu0 %263  ;;  %2778 = vst [vmem:[#allocation23_spill] sm:$0xff] %v2034_v15  ;;  %497 = vmatpush.msra.mxu1 %v2042_v26  ;;  %637 = vmatpush.msrb.mxu2 %v2290_v12 }
  0xa7   :  { %v274_v22 = vmul.f32 %v1989_v34, %v271_v60  ;;  %v268_v5 = vsel %vm2753_vm10, %v264_v18, %v266_v50  ;;  %2779 = vst [vmem:[#allocation24_spill] sm:$0xff] %v2042_v26  ;;  %478 = vmatpush.msra.mxu0 %v2048_v29  ;;  %661 = vmatpush.msrb.mxu3 %v2307_v49 }
  0xa8   :  { %v273_v6 = vmul.f32 %v1989_v34, %v268_v5  ;;  %2780 = vst [vmem:[#allocation25_spill] sm:$0xff] %v2048_v29  ;;  %498 = vmatpush.msra.mxu1 %v2054_v30  ;;  %v2073_v5 = vld [vmem:[%s2703_s6 + $0xd0] sm:$0xff] }
  0xa9   :  { %v276_v7 = vadd.f32 %v274_v22, %v261_v23  ;;  %2781 = vst [vmem:[#allocation26_spill] sm:$0xff] %v2054_v30  ;;  %v420_v23 = vsel %vm362_vm3, %v1643_v1, -inf  ;;  %v2068_v22 = vld [vmem:[%s2703_s6 + $0x50] sm:$0xff] }
  0xaa   :  { %v275_v16 = vadd.f32 %v273_v6, %v260_v41  ;;  %366 = vrot.lane.b32.xlu0 %v1638_v0, %s1574_s20  ;;  %v279_v41 = vpop.permute.xlu2 %278  ;;  %2782 = vst [vmem:[#allocation27_spill] sm:$0xff] %v2068_v22  ;;  %479 = vmatpush.msra.mxu0 %v2068_v22 }
  0xab   :  { %2783 = vst [vmem:[#allocation28_spill] sm:$0xff] %v2073_v5  ;;  %499 = vmatpush.msra.mxu1 %v2073_v5 }
  0xac   :  { %2806 = vst [vmem:[#allocation51_spill] sm:$0xff] %v2290_v12 }
  0xad   :  { %2807 = vst [vmem:[#allocation52_spill] sm:$0xff] %v2295_v11 }
  0xae   :  { %v281_v50 = vpop.permute.xlu0 %280  ;;  %2809 = vst [vmem:[#allocation54_spill] sm:$0xff] %v2307_v49 }
  0xaf   :  { %v282_v60 = vsel %vm2753_vm10, %v279_v41, %v281_v50  ;;  %v285_v18 = vsel %vm2753_vm10, %v281_v50, 0.0  ;;  %v2082_v41 = vld [vmem:[%s2703_s6 + $0x48] sm:$0xff]  ;;  %vm2759_vm10 = vcmask 48128  }
  0xb0   :  { %v287_v6 = vmul.f32 %v2056_v31, %v282_v60  ;;  %v288_v29 = vmul.f32 %v2056_v31, %v285_v18  ;;  %421 = vmax.xlane.f32.xlu1 %v420_v23  ;;  %2784 = vst [vmem:[#allocation29_spill] sm:$0xff] %v2082_v41  ;;  %v2087_v50 = vld [vmem:[%s2703_s6 + $0xc8] sm:$0xff]  ;;  %480 = vmatpush.msra.mxu0 %v2082_v41  ;;  %v2098_v23 = vld [vmem:[%s2703_s6 + $0x40] sm:$0xff] }
  0xb1   :  { %2785 = vst [vmem:[#allocation30_spill] sm:$0xff] %v2087_v50  ;;  %500 = vmatpush.msra.mxu1 %v2087_v50  ;;  %v2103_v18 = vld [vmem:[%s2703_s6 + $0xc0] sm:$0xff] }
  0xb2   :  { %v2089_v30 = vadd.f32 %v287_v6, %v275_v16  ;;  %v2091_v60 = vadd.f32 %v288_v29, %v276_v7  ;;  %2788 = vst [vmem:[#allocation33_spill] sm:$0xff] %v2098_v23  ;;  %v2108_v16 = vld [vmem:[%s2703_s6 + $0x38] sm:$0xff]  ;;  %481 = vmatpush.msra.mxu0 %v2098_v23  ;;  %v2122_v29 = vld [vmem:[%s2703_s6 + $0x30] sm:$0xff] }
  0xb3   :  { %2789 = vst [vmem:[#allocation34_spill] sm:$0xff] %v2103_v18  ;;  %501 = vmatpush.msra.mxu1 %v2103_v18  ;;  %v2115_v7 = vld [vmem:[%s2703_s6 + $0xb8] sm:$0xff]  ;;  %v2127_v6 = vld [vmem:[%s2703_s6 + $0xb0] sm:$0xff] }
  0xb4   :  { %2786 = vst [vmem:[#allocation31_spill] sm:$0xff] %v2089_v30  ;;  %482 = vmatpush.msra.mxu0 %v2108_v16  ;;  %v2136_v30 = vld [vmem:[%s2703_s6 + $0x28] sm:$0xff] }
  0xb5   :  { %2787 = vst [vmem:[#allocation32_spill] sm:$0xff] %v2091_v60  ;;  %502 = vmatpush.msra.mxu1 %v2115_v7  ;;  %v434_v60 = vsel %vm378_vm6, %v1643_v1, -inf }
  0xb6   :  { %2790 = vst [vmem:[#allocation35_spill] sm:$0xff] %v2108_v16  ;;  %483 = vmatpush.msra.mxu0 %v2122_v29  ;;  %v2158_v16 = vld [vmem:[%s2703_s6 + $0x18] sm:$0xff] }
  0xb7   :  { %2791 = vst [vmem:[#allocation36_spill] sm:$0xff] %v2115_v7  ;;  %503 = vmatpush.msra.mxu1 %v2127_v6  ;;  %v2141_v7 = vld [vmem:[%s2703_s6 + $0xa8] sm:$0xff] }
  0xb8   :  { %2792 = vst [vmem:[#allocation37_spill] sm:$0xff] %v2122_v29  ;;  %484 = vmatpush.msra.mxu0 %v2136_v30  ;;  %v2153_v29 = vld [vmem:[%s2703_s6 + $0xa0] sm:$0xff] }
  0xb9   :  { %2793 = vst [vmem:[#allocation38_spill] sm:$0xff] %v2127_v6  ;;  %504 = vmatpush.msra.mxu1 %v2141_v7  ;;  %v2148_v6 = vld [vmem:[%s2703_s6 + $0x20] sm:$0xff] }
  0xba   :  { %2794 = vst [vmem:[#allocation39_spill] sm:$0xff] %v2136_v30  ;;  %485 = vmatpush.msra.mxu0 %v2148_v6  ;;  %v2172_v30 = vld [vmem:[%s2703_s6 + $0x10] sm:$0xff] }
  0xbb   :  { %2795 = vst [vmem:[#allocation40_spill] sm:$0xff] %v2141_v7  ;;  %v2164_v7 = vld [vmem:[%s2703_s6 + $0x98] sm:$0xff]  ;;  %505 = vmatpush.msra.mxu1 %v2153_v29 }
  0xbc   :  { %2796 = vst [vmem:[#allocation41_spill] sm:$0xff] %v2148_v6  ;;  %486 = vmatpush.msra.mxu0 %v2158_v16 }
  0xbd   :  { %2797 = vst [vmem:[#allocation42_spill] sm:$0xff] %v2153_v29  ;;  %435 = vmax.xlane.f32.xlu2 %v434_v60  ;;  %506 = vmatpush.msra.mxu1 %v2164_v7  ;;  %v2177_v60 = vld [vmem:[%s2703_s6 + $0x90] sm:$0xff]  ;;  %v2194_v29 = vld [vmem:[%s2703_s6] sm:$0xff] }
  0xbe   :  { %2798 = vst [vmem:[#allocation43_spill] sm:$0xff] %v2158_v16  ;;  %487 = vmatpush.msra.mxu0 %v2172_v30  ;;  %v2184_v16 = vld [vmem:[%s2703_s6 + $0x8] sm:$0xff] }
  0xbf   :  { %2799 = vst [vmem:[#allocation44_spill] sm:$0xff] %v2164_v7  ;;  %507 = vmatpush.msra.mxu1 %v2177_v60  ;;  %v2189_v7 = vld [vmem:[%s2703_s6 + $0x88] sm:$0xff] }
  0xc0   :  { %2800 = vst [vmem:[#allocation45_spill] sm:$0xff] %v2172_v30  ;;  %488 = vmatpush.msra.mxu0 %v2184_v16 }
  0xc1   :  { %2801 = vst [vmem:[#allocation46_spill] sm:$0xff] %v2177_v60  ;;  %v2200_v60 = vld [vmem:[%s2703_s6 + $0x80] sm:$0xff]  ;;  %508 = vmatpush.msra.mxu1 %v2189_v7 }
  0xc2   :  { %2802 = vst [vmem:[#allocation47_spill] sm:$0xff] %v2184_v16  ;;  %489 = vmatpush.msra.mxu0 %v2194_v29  ;;  %v441_v16 = vsel %vm386_vm7, %v1643_v1, -inf }
  0xc3   :  { %2803 = vst [vmem:[#allocation48_spill] sm:$0xff] %v2189_v7  ;;  %509 = vmatpush.msra.mxu1 %v2200_v60  ;;  %490 = vmatmul.f32.vlgmr.msra.gmra.mxu0 %v1638_v0 }
  0xc4   :  { %2804 = vst [vmem:[#allocation49_spill] sm:$0xff] %v2194_v29  ;;  %510 = vmatmul.f32.vlgmr.msra.gmra.mxu1 %v1643_v1  ;;  %v2223_v29 = vld [vmem:[%s2698_s1 + $0x10] sm:$0xff] }
  0xc5   :  { %2805 = vst [vmem:[#allocation50_spill] sm:$0xff] %v2200_v60  ;;  %v2218_v60 = vld [vmem:[%s2698_s1 + $0x18] sm:$0xff] }
  0xc6   :  { %v798_v7 = vrot.slane %v2218_v60, 4 }
  0xc8   :  { %v799_v6 = vmax.f32 %v2218_v60, %v798_v7  ;;  %v811_v22 = vadd.f32 %v2218_v60, %v798_v7 }
  0xc9   :  { %374 = vrot.lane.b32.xlu1 %v1638_v0, %s1568_s0 }
  0xca   :  { %v800_v50 = vrot.slane %v799_v6, 2  ;;  %v812_v15 = vrot.slane %v811_v22, 2 }
  0xcc   :  { %v801_v33 = vmax.f32 %v799_v6, %v800_v50 }
  0xd1   :  { %395 = vrot.lane.b32.xlu1 %v1643_v1, %s1570_s22 }
  0xd4   :  { %442 = vmax.xlane.f32.xlu0 %v441_v16  ;;  %v792_v16 = vrot.slane %v2223_v29, 4 }
  0xd5   :  { %382 = vrot.lane.b32.xlu2 %v1638_v0, %s1569_s21 }
  0xd6   :  { %v793_v30 = vmax.f32 %v2223_v29, %v792_v16  ;;  %v805_v18 = vadd.f32 %v2223_v29, %v792_v16  ;;  %v802_v16 = vrot.slane %v801_v33, 1 }
  0xd8   :  { %v794_v23 = vrot.slane %v793_v30, 2  ;;  %v806_v41 = vrot.slane %v805_v18, 2 }
  0xd9   :  { %402 = vrot.lane.b32.xlu1 %v1643_v1, %s1571_s23 }
  0xda   :  { %v795_v5 = vmax.f32 %v793_v30, %v794_v23  ;;  %v807_v32 = vadd.f32 %v806_v41, %v805_v18  ;;  %v813_v30 = vadd.f32 %v812_v15, %v811_v22  ;;  %v2245_v23 = vmax.f32 %v801_v33, %v802_v16  ;;  %v341_v33 = vpop.xlane.xlu2 %340  ;;  %v332_v15 = vpop.xlane.xlu1 %331 }
  0xdc   :  { %v796_v26 = vrot.slane %v795_v5, 1  ;;  %v808_v10 = vrot.slane %v807_v32, 1  ;;  %v814_v41 = vrot.slane %v813_v30, 1 }
  0xdd   :  { %416 = vrot.lane.b32.xlu2 %v1643_v1, %s1573_s30 }
  0xde   :  { %v2243_v21 = vmax.f32 %v795_v5, %v796_v26  ;;  %v2247_v50 = vadd.f32 %v808_v10, %v807_v32  ;;  %v2255_v18 = vadd.f32 %v814_v41, %v813_v30  ;;  %v349_v10 = vpop.xlane.xlu0 %348  ;;  %v1481_v5 = vpack.i.bf16 %v2218_v60, %v2223_v29 }
  0xe1   :  { %423 = vrot.lane.b32.xlu1 %v1643_v1, %s1574_s20 }
  0xe2   :  { %v357_v22 = vpop.xlane.xlu2 %356  ;;  %v365_v7 = vpop.xlane.xlu1 %364 }
  0xe5   :  { %430 = vrot.lane.b32.xlu2 %v1643_v1, %s1568_s0 }
  0xe6   :  { %v381_v32 = vpop.xlane.xlu0 %380 }
  0xe8   :  { %409 = vrot.lane.b32.xlu0 %v1643_v1, %s1572_s15 }
  0xe9   :  { %437 = vrot.lane.b32.xlu1 %v1643_v1, %s1569_s21 }
  0xea   :  { %v373_v16 = vpop.xlane.xlu2 %372 }
  0xed   :  { %819 = vrot.lane.b32.xlu2 %v2243_v21, %s1568_s0 }
  0xee   :  { %v393_v26 = vpop.xlane.xlu0 %392 }
  0xf0   :  { %821 = vrot.lane.b32.xlu0 %v2245_v23, %s1568_s0  ;;  %v335_v30 = vpop.permute.xlu1 %334 }
  0xf1   :  { %835 = vrot.lane.b32.xlu1 %v2247_v50, %s1568_s0 }
  0xf2   :  { %v389_v57 = vpop.xlane.xlu2 %388 }
  0xf5   :  { %837 = vrot.lane.b32.xlu2 %v2255_v18, %s1568_s0 }
  0xf6   :  { %v401_v6 = vpop.xlane.xlu0 %400 }
  0xf8   :  { %849 = vrot.lane.b32.xlu0 %v2243_v21, %s1569_s21  ;;  %v351_v12 = vpop.permute.xlu1 %350 }
  0xf9   :  { %851 = vrot.lane.b32.xlu1 %v2245_v23, %s1569_s21 }
  0xfa   :  { %v343_v56 = vpop.permute.xlu2 %342 }
  0xfd   :  { %863 = vrot.lane.b32.xlu2 %v2247_v50, %s1569_s21 }
  0xfe   :  { %v408_v41 = vpop.xlane.xlu0 %407 }
 0x100   :  { %865 = vrot.lane.b32.xlu0 %v2255_v18, %s1569_s21 }
 0x101   :  { %889 = vrot.lane.b32.xlu1 %v2243_v21, %s1570_s22 }
 0x105   :  { %891 = vrot.lane.b32.xlu2 %v2245_v23, %s1570_s22 }
 0x108   :  { %903 = vrot.lane.b32.xlu0 %v2247_v50, %s1570_s22 }
 0x109   :  { %905 = vrot.lane.b32.xlu1 %v2255_v18, %s1570_s22 }
 0x10d   :  { %917 = vrot.lane.b32.xlu2 %v2243_v21, %s1571_s23 }
 0x110   :  { %919 = vrot.lane.b32.xlu0 %v2245_v23, %s1571_s23 }
 0x111   :  { %931 = vrot.lane.b32.xlu1 %v2247_v50, %s1571_s23 }
 0x115   :  { %933 = vrot.lane.b32.xlu2 %v2255_v18, %s1571_s23 }
 0x119   :  { %1482 = vrot.lane.b32.xlu1 %v1481_v5, %s1570_s22  ;;  %s127_s22 = sld [smem:[#allocation2]] }
 0x11f   :  { %v531_v63 = vpop.f32.mrf.mxu2 }
 0x121   :  { %1487 = vrot.lane.b32.xlu1 %v1481_v5, %s1571_s23  ;;  %v2302_v5 = vld [vmem:[%s2702_s5] sm:$0xff]  ;;  %s1430_s23 = sld [smem:[#allocation2 + $0x3]] }
 0x122   :  { %2808 = vst [vmem:[#allocation53_spill] sm:$0xff] %v2302_v5  ;;  %638 = vmatpush.msrb.mxu2 %v2302_v5 }
 0x123   :  { %v422_v48 = vpop.xlane.xlu1 %421 }
 0x126   :  { %v551_v62 = vpop.f32.mrf.mxu3 }
 0x127   :  { %v552_v53 = vadd.f32 %v551_v62, %v531_v63  ;;  %v415_v62 = vpop.xlane.xlu0 %414  ;;  %v445_v63 = vsel %vm2754_vm11, %v332_v15, %v341_v33  ;;  %vm2760_vm11 = vcmask 56320   ;;  %v359_v33 = vpop.permute.xlu2 %358 }
 0x128   :  { %v447_v11 = vsel %vm2757_vm12, %v445_v63, %v349_v10  ;;  %v990_v63 = vsel %vm2762_vm0, %v2223_v29, -inf  ;;  %vm462_vm12 = vcmask 80896   ;;  %vm472_vm0 = vcmask 121856  }
 0x129   :  { %1445 = vmatmul.msk.f32.vlgmr.msrb.gmra.mxu2 %vm197_vm1, %v552_v53  ;;  %v449_v46 = vsel %vm2755_vm13, %v447_v11, %v357_v22  ;;  %v982_v53 = vsel %vm197_vm1, %v2223_v29, -inf  ;;  %vm458_vm13 = vcmask 64512  }
 0x12a   :  { %v451_v5 = vsel %vm2756_vm14, %v449_v46, %v365_v7  ;;  %vm460_vm14 = vcmask 72704   ;;  %v337_v46 = vmax.f32 %v1638_v0, %v335_v30  ;;  %v1004_v0 = vsel %vm354_vm2, %v2223_v29, -inf }
 0x12b   :  { %v453_v45 = vsel %vm2758_vm15, %v451_v5, %v373_v16  ;;  %vm464_vm15 = vcmask 89088  }
 0x12c   :  { %v455_v10 = vsel %vm2759_vm10, %v453_v45, %v381_v32  ;;  %vm466_vm10 = vcmask 97280   ;;  %v345_v45 = vmax.f32 %v337_v46, %v343_v56  ;;  %v2334_v56 = vld [vmem:[%s2700_s3] sm:$0xff]  ;;  %v997_v46 = vsel %vm346_vm4, %v2223_v29, -inf  ;;  %s1575_s3 = smov [#allocation5]  }
 0x12d   :  { %v457_v11 = vsel %vm2760_vm11, %v455_v10, %v389_v57  ;;  %vm468_vm11 = vcmask 105472   ;;  %s1413_s19 = sshll.u32 %s1575_s3, 4  ;;  %s1414_s19 = int_to_ptr.vmem [resolvable:$true] %s1413_s19 }
 0x12e   :  { %v459_v22 = vsel %vm458_vm13, %v457_v11, %v393_v26 }
 0x12f   :  { %v429_v49 = vpop.xlane.xlu0 %428  ;;  %v461_v16 = vsel %vm460_vm14, %v459_v22, %v401_v6 }
 0x130   :  { %v463_v32 = vsel %vm462_vm12, %v461_v16, %v408_v41 }
 0x131   :  { %v465_v5 = vsel %vm464_vm15, %v463_v32, %v415_v62  ;;  %v1011_v32 = vsel %vm362_vm3, %v2223_v29, -inf }
 0x132   :  { %v467_v57 = vsel %vm466_vm10, %v465_v5, %v422_v48 }
 0x133   :  { %v469_v41 = vsel %vm468_vm11, %v467_v57, %v429_v49 }
 0x137   :  { %v367_v7 = vpop.permute.xlu0 %366 }
 0x13a   :  { %983 = vmax.xlane.f32.xlu0 %v982_v53  ;;  %v436_v53 = vpop.xlane.xlu2 %435 }
 0x13b   :  { %v375_v15 = vpop.permute.xlu1 %374  ;;  %v471_v48 = vsel %vm470_vm9, %v469_v41, %v436_v53 }
 0x13e   :  { %991 = vmax.xlane.f32.xlu2 %v990_v63  ;;  %v353_v63 = vmax.f32 %v345_v45, %v351_v12 }
 0x140   :  { %v491_v30 = vpop.f32.mrf.mxu0  ;;  %v361_v12 = vmax.f32 %v353_v63, %v359_v33 }
 0x141   :  { %v511_v10 = vpop.f32.mrf.mxu1 }
 0x142   :  { %v512_v6 = vadd.f32 %v511_v10, %v491_v30  ;;  %v369_v22 = vmax.f32 %v361_v12, %v367_v7  ;;  %v383_v16 = vpop.permute.xlu2 %382  ;;  %v1051_v12 = vsel %vm346_vm4, %v2218_v60, -inf }
 0x143   :  { %v396_v26 = vpop.permute.xlu1 %395 }
 0x144   :  { %572 = vmatpush.msrb.mxu0 %v512_v6  ;;  %v377_v49 = vmax.f32 %v369_v22, %v375_v15  ;;  %v1018_v15 = vsel %vm370_vm5, %v2223_v29, -inf }
 0x145   :  { %1443 = vmatmul.msk.f32.vlgmr.msrb.gmra.mxu0 %vm458_vm13, %v2334_v56 }
 0x146   :  { %1005 = vmax.xlane.f32.xlu2 %v1004_v0  ;;  %v385_v5 = vmax.f32 %v377_v49, %v383_v16 }
 0x147   :  { %v443_v62 = vpop.xlane.xlu0 %442 }
 0x148   :  { %v473_v11 = vsel %vm472_vm0, %v471_v48, %v443_v62  ;;  %v390_v53 = vmax.f32 %v385_v5, %v1643_v1 }
 0x149   :  { %1446 = vmatmul.msk.f32.vlgmr.msrb.gmra.mxu3 %vm197_vm1, %v473_v11  ;;  %v2362_v11 = vld [vmem:[%s2699_s2] sm:$0xff] }
 0x14a   :  { %v417_v57 = vpop.permute.xlu2 %416  ;;  %v398_v7 = vmax.f32 %v390_v53, %v396_v26  ;;  %v1025_v26 = vsel %vm378_vm6, %v2223_v29, -inf }
 0x14b   :  { %998 = vmax.xlane.f32.xlu1 %v997_v46  ;;  %v403_v45 = vpop.permute.xlu1 %402  ;;  %v1036_v46 = vsel %vm197_vm1, %v2218_v60, -inf }
 0x14c   :  { %v405_v0 = vmax.f32 %v398_v7, %v403_v45  ;;  %v1058_v7 = vsel %vm354_vm2, %v2218_v60, -inf  ;;  %vm2810_vm2 = vcmask 261248  }
 0x14e   :  { %1000 = vrot.lane.b32.xlu0 %v2223_v29, %s1572_s15 }
 0x152   :  { %v431_v6 = vpop.permute.xlu2 %430 }
 0x153   :  { %1012 = vmax.xlane.f32.xlu1 %v1011_v32  ;;  %v424_v33 = vpop.permute.xlu1 %423 }
 0x156   :  { %1014 = vrot.lane.b32.xlu0 %v2223_v29, %s1574_s20 }
 0x15a   :  { %v410_v30 = vpop.permute.xlu0 %409  ;;  %v820_v16 = vpop.permute.xlu2 %819 }
 0x15b   :  { %v412_v10 = vmax.f32 %v405_v0, %v410_v30  ;;  %1019 = vmax.xlane.f32.xlu1 %v1018_v15  ;;  %v438_v41 = vpop.permute.xlu1 %437  ;;  %v826_v45 = vsel %vm166_vm8, 0.0, %v820_v16  ;;  %v1065_v0 = vsel %vm362_vm3, %v2218_v60, -inf  ;;  %vm2811_vm3 = vcmask 916480  }
 0x15c   :  { %vm2812_vm4 = vmmov %vm2811_vm3 }
 0x15d   :  { %v419_v63 = vmax.f32 %v412_v10, %v417_v57  ;;  %v828_v57 = vmul.f32 %v826_v45, %v1732_v42 }
 0x15e   :  { %1021 = vrot.lane.b32.xlu0 %v2223_v29, %s1568_s0  ;;  %1007 = vrot.lane.b32.xlu2 %v2223_v29, %s1573_s30 }
 0x15f   :  { %v426_v1 = vmax.f32 %v419_v63, %v424_v33  ;;  %v1032_v63 = vsel %vm386_vm7, %v2223_v29, -inf }
 0x161   :  { %v433_v48 = vmax.f32 %v426_v1, %v431_v6 }
 0x162   :  { %v822_v32 = vpop.permute.xlu0 %821  ;;  %v838_v10 = vpop.permute.xlu2 %837 }
 0x163   :  { %v440_v62 = vmax.f32 %v433_v48, %v438_v41  ;;  %1026 = vmax.xlane.f32.xlu1 %v1025_v26  ;;  %v836_v22 = vpop.permute.xlu1 %835  ;;  %v823_v53 = vsel %vm166_vm8, %v820_v16, %v822_v32  ;;  %v1079_v32 = vsel %vm378_vm6, %v2218_v60, -inf  ;;  %vm2814_vm6 = vmmov %vm2811_vm3 }
 0x164   :  { %v842_v49 = vsel %vm166_vm8, 0.0, %v836_v22  ;;  %v829_v30 = vmul.f32 %v823_v53, %v1732_v42  ;;  %v839_v6 = vsel %vm166_vm8, %v836_v22, %v838_v10  ;;  %v1072_v42 = vsel %vm370_vm5, %v2218_v60, -inf  ;;  %vm2813_vm5 = vmmov %vm2811_vm3 }
 0x165   :  { %595 = vmatpush.msrb.mxu1 %v440_v62  ;;  %v844_v5 = vmul.f32 %v842_v49, %v1730_v40  ;;  %v845_v41 = vmul.f32 %v839_v6, %v1730_v40  ;;  %v1044_v40 = vsel %vm2810_vm2, %v2218_v60, -inf  ;;  %v884_v10 = vmul.f32 %v2247_v50, %v1903_v39 }
 0x166   :  { %1444 = vmatmul.msk.f32.vlgmr.msrb.gmra.mxu1 %vm458_vm13, %v2362_v11  ;;  %1028 = vrot.lane.b32.xlu2 %v2223_v29, %s1569_s21 }
 0x167   :  { %v846_v33 = vadd.f32 %v844_v5, %v828_v57 }
 0x16a   :  { %v850_v1 = vpop.permute.xlu0 %849  ;;  %v864_v22 = vpop.permute.xlu2 %863 }
 0x16b   :  { %1037 = vmax.xlane.f32.xlu1 %v1036_v46  ;;  %v852_v15 = vpop.permute.xlu1 %851  ;;  %v856_v48 = vsel %vm197_vm1, 0.0, %v850_v1  ;;  %v870_v5 = vsel %vm197_vm1, 0.0, %v864_v22 }
 0x16c   :  { %v853_v26 = vsel %vm197_vm1, %v850_v1, %v852_v15  ;;  %v858_v62 = vmul.f32 %v856_v48, %v1747_v47  ;;  %v872_v53 = vmul.f32 %v870_v5, %v1861_v24 }
 0x16d   :  { %v859_v46 = vmul.f32 %v853_v26, %v1747_v47  ;;  %v878_v47 = vmul.f32 %v2243_v21, %v1864_v25  ;;  %v885_v21 = vmul.f32 %v2255_v18, %v1903_v39 }
 0x16e   :  { %v860_v49 = vadd.f32 %v858_v62, %v846_v33  ;;  %v879_v33 = vmul.f32 %v2245_v23, %v1864_v25 }
 0x172   :  { %v866_v57 = vpop.permute.xlu0 %865  ;;  %v892_v23 = vpop.permute.xlu2 %891 }
 0x173   :  { %1052 = vmax.xlane.f32.xlu1 %v1051_v12  ;;  %v847_v12 = vadd.f32 %v845_v41, %v829_v30  ;;  %v890_v16 = vpop.permute.xlu1 %889  ;;  %v874_v30 = vadd.f32 %v872_v53, %v860_v49  ;;  %v896_v62 = vsel %vm2813_vm5, %v892_v23, 0.0 }
 0x174   :  { %v893_v48 = vsel %vm2812_vm4, %v890_v16, %v892_v23  ;;  %v899_v39 = vmul.f32 %v896_v62, %v1936_v61 }
 0x175   :  { %v861_v45 = vadd.f32 %v859_v46, %v847_v12  ;;  %v880_v6 = vadd.f32 %v878_v47, %v874_v30 }
 0x17a   :  { %v904_v46 = vpop.permute.xlu0 %903 }
 0x17b   :  { %1059 = vmax.xlane.f32.xlu1 %v1058_v7  ;;  %v867_v7 = vsel %vm197_vm1, %v864_v22, %v866_v57  ;;  %v906_v1 = vpop.permute.xlu1 %905 }
 0x17c   :  { %v873_v15 = vmul.f32 %v867_v7, %v1861_v24  ;;  %v910_v41 = vsel %vm2811_vm3, %v906_v1, 0.0  ;;  %v886_v24 = vadd.f32 %v884_v10, %v880_v6  ;;  %v907_v18 = vsel %vm2814_vm6, %v904_v46, %v906_v1  ;;  %v2452_v1 = vld [vmem:[%s2706_s9 + $0x18] sm:$0xff] }
 0x17d   :  { %v913_v50 = vmul.f32 %v910_v41, %v1952_v2  ;;  %v912_v12 = vmul.f32 %v907_v18, %v1952_v2  ;;  %777 = vmatpush.msra.mxu3 %v2452_v1  ;;  %v2459_v41 = vld [vmem:[%s2706_s9] sm:$0xff]  ;;  %vm2852_vm6 = vcmask 7168  }
 0x182   :  { %v920_v5 = vpop.permute.xlu0 %919 }
 0x183   :  { %1066 = vmax.xlane.f32.xlu1 %v1065_v0  ;;  %v1086_v0 = vsel %vm386_vm7, %v2218_v60, -inf  ;;  %vm2815_vm7 = vcmask 785408   ;;  %v932_v7 = vpop.permute.xlu1 %931 }
 0x184   :  { %vm2816_vm8 = vmmov %vm2815_vm7 }
 0x185   :  { %v924_v57 = vsel %vm2816_vm8, %v920_v5, 0.0  ;;  %vm2817_vm2 = vmmov %vm2815_vm7 }
 0x186   :  { %v927_v53 = vmul.f32 %v924_v57, %v1989_v34  ;;  %vm2818_vm3 = vmmov %vm2817_vm2  ;;  %v2827_v57 = vld [vmem:[#allocation12_spill] sm:$0xff] }
 0x188   :  { %1033 = vmax.xlane.f32.xlu0 %v1032_v63  ;;  %v875_v63 = vadd.f32 %v873_v15, %v861_v45 }
 0x18a   :  { %v881_v25 = vadd.f32 %v879_v33, %v875_v63 }
 0x18b   :  { %1073 = vmax.xlane.f32.xlu1 %v1072_v42  ;;  %v898_v42 = vmul.f32 %v893_v48, %v1936_v61 }
 0x18c   :  { %v887_v26 = vadd.f32 %v885_v21, %v881_v25  ;;  %v2434_v21 = vpop.permute.xlu1 %1482  ;;  %v2464_v25 = vld [vmem:[%s2706_s9 + $0x8] sm:$0xff] }
 0x18d   :  { %v900_v49 = vadd.f32 %v898_v42, %v886_v24  ;;  %778 = vmatpush.msra.mxu3 %v2464_v25  ;;  %v1484_v48 = vunpack.i.l.bf16 %v2434_v21  ;;  %v2821_v42 = vld [vmem:[#allocation18_spill] sm:$0xff] }
 0x18e   :  { %v901_v45 = vadd.f32 %v899_v39, %v887_v26 }
 0x18f   :  { %1045 = vmax.xlane.f32.xlu2 %v1044_v40  ;;  %v914_v40 = vadd.f32 %v912_v12, %v900_v49  ;;  %1164 = vmatpush.msrb.mxu3 %v1724_v38  ;;  %v989_v38 = vmax.f32 %v2223_v29, %v1484_v48  ;;  %v2822_v12 = vld [vmem:[#allocation9_spill] sm:$0xff]  ;;  %v2823_v49 = vld [vmem:[#allocation10_spill] sm:$0xff] }
 0x190   :  { %1080 = vmax.xlane.f32.xlu0 %v1079_v32  ;;  %v915_v22 = vadd.f32 %v913_v50, %v901_v45  ;;  %v918_v32 = vpop.permute.xlu2 %917  ;;  %v2820_v50 = vld [vmem:[#allocation17_spill] sm:$0xff]  ;;  %v2824_v45 = vld [vmem:[#allocation19_spill] sm:$0xff] }
 0x191   :  { %v921_v16 = vsel %vm2815_vm7, %v918_v32, %v920_v5  ;;  %1165 = vmatpush.msrb.mxu3 %v1742_v44 }
 0x192   :  { %v926_v47 = vmul.f32 %v921_v16, %v1989_v34  ;;  %v929_v33 = vadd.f32 %v927_v53, %v915_v22  ;;  %v1485_v22 = vunpack.i.h.bf16 %v2434_v21  ;;  %v2826_v16 = vld [vmem:[#allocation11_spill] sm:$0xff]  ;;  %v2829_v53 = vld [vmem:[#allocation22_spill] sm:$0xff] }
 0x193   :  { %1087 = vmax.xlane.f32.xlu1 %v1086_v0  ;;  %1166 = vmatpush.msrb.mxu3 %v1762_v52 }
 0x194   :  { %v928_v61 = vadd.f32 %v926_v47, %v914_v40  ;;  %v2442_v6 = vpop.permute.xlu1 %1487  ;;  %v2825_v40 = vld [vmem:[#allocation20_spill] sm:$0xff]  ;;  %v2828_v47 = vld [vmem:[#allocation21_spill] sm:$0xff] }
 0x195   :  { %1167 = vmatpush.msrb.mxu3 %v1775_v55 }
 0x197   :  { %1168 = vmatpush.msrb.mxu3 %v1786_v59 }
 0x198   :  { %v934_v2 = vpop.permute.xlu2 %933 }
 0x199   :  { %v935_v15 = vsel %vm2817_vm2, %v932_v7, %v934_v2  ;;  %v938_v0 = vsel %vm2818_vm3, %v934_v2, 0.0  ;;  %1169 = vmatpush.msrb.mxu3 %v1809_v4  ;;  %v1490_v7 = vunpack.i.h.bf16 %v2442_v6  ;;  %v2831_v2 = vld [vmem:[#allocation14_spill] sm:$0xff]  ;;  %vm2857_vm2 = vcmask 15360  }
 0x19a   :  { %v940_v30 = vmul.f32 %v935_v15, %v2056_v31  ;;  %v941_v10 = vmul.f32 %v938_v0, %v2056_v31  ;;  %v2447_v31 = vld [vmem:[%s2706_s9 + $0x10] sm:$0xff]  ;;  %s2485_s9 = sld [smem:[#allocation2 + $0x2]]  ;;  %v2832_v15 = vld [vmem:[#allocation23_spill] sm:$0xff]  ;;  %v2833_v0 = vld [vmem:[#allocation24_spill] sm:$0xff]  ;;  %vm2860_vm3 = vcmask 23552  }
 0x19b   :  { %757 = vmatpush.msra.mxu2 %v2447_v31  ;;  %1170 = vmatpush.msrb.mxu3 %v1824_v9  ;;  %v2509_v9 = vld [vmem:[%s2704_s7 + $0x10] sm:$0xff] }
 0x19c   :  { %v2430_v63 = vadd.f32 %v940_v30, %v928_v61  ;;  %v2432_v34 = vadd.f32 %v941_v10, %v929_v33  ;;  %708 = vmatpush.msra.mxu0 %v2509_v9  ;;  %v2830_v33 = vld [vmem:[#allocation13_spill] sm:$0xff]  ;;  %v2834_v30 = vld [vmem:[#allocation15_spill] sm:$0xff]  ;;  %v2835_v10 = vld [vmem:[#allocation16_spill] sm:$0xff] }
 0x19d   :  { %758 = vmatpush.msra.mxu2 %v2459_v41  ;;  %1171 = vmatpush.msrb.mxu3 %v1842_v14 }
 0x19f   :  { %1144 = vmatpush.msrb.mxu2 %v1719_v37  ;;  %1172 = vmatpush.msrb.mxu3 %v1858_v20  ;;  %v2525_v20 = vld [vmem:[%s2704_s7] sm:$0xff] }
 0x1a0   :  { %v666_v59 = vstv %s2485_s9  ;;  %709 = vmatpush.msra.mxu0 %v2525_v20 }
 0x1a1   :  { %1145 = vmatpush.msrb.mxu2 %v1737_v43  ;;  %v1489_v43 = vunpack.i.l.bf16 %v2442_v6  ;;  %1173 = vmatpush.msrb.mxu3 %v1878_v28  ;;  %v2837_v6 = vld [vmem:[#allocation26_spill] sm:$0xff] }
 0x1a2   :  { %1104 = vmatpush.msrb.mxu0 %v2820_v50 }
 0x1a3   :  { %1146 = vmatpush.msrb.mxu2 %v1757_v51  ;;  %v996_v52 = vmax.f32 %v989_v38, %v1489_v43  ;;  %1174 = vmatpush.msrb.mxu3 %v1900_v36 }
 0x1a4   :  { %1054 = vrot.lane.b32.xlu0 %v2218_v60, %s1572_s15  ;;  %1105 = vmatpush.msrb.mxu0 %v2824_v45 }
 0x1a5   :  { %1147 = vmatpush.msrb.mxu2 %v1770_v54 }
 0x1a6   :  { %1106 = vmatpush.msrb.mxu0 %v2828_v47  ;;  %v2850_v47 = vld [vmem:[#allocation41_spill] sm:$0xff] }
 0x1a7   :  { %1061 = vrot.lane.b32.xlu2 %v2218_v60, %s1573_s30  ;;  %1148 = vmatpush.msrb.mxu2 %v1781_v58  ;;  %s1415_s30 = sshll.u32 %s2707_s10, 4  ;;  %s1416_s30 = int_to_ptr.hbm [resolvable:$true] %s1415_s30 }
 0x1a8   :  { %1107 = vmatpush.msrb.mxu0 %v2832_v15  ;;  %v2854_v15 = vld [vmem:[#allocation44_spill] sm:$0xff] }
 0x1a9   :  { %1149 = vmatpush.msrb.mxu2 %v1804_v3 }
 0x1ab   :  { %1150 = vmatpush.msrb.mxu2 %v1819_v8 }
 0x1ac   :  { %1068 = vrot.lane.b32.xlu1 %v2218_v60, %s1574_s20  ;;  %1075 = vrot.lane.b32.xlu0 %v2218_v60, %s1568_s0  ;;  %v640_v54 = vpop.f32.mrf.mxu2 }
 0x1ad   :  { %v2468_v23 = vpop.xlane.xlu0 %983  ;;  %1151 = vmatpush.msrb.mxu2 %v1837_v13  ;;  %v2514_v13 = vld [vmem:[%s2704_s7 + $0x18] sm:$0xff] }
 0x1ae   :  { %728 = vmatpush.msra.mxu1 %v2514_v13 }
 0x1af   :  { %1082 = vrot.lane.b32.xlu2 %v2218_v60, %s1569_s21  ;;  %1152 = vmatpush.msrb.mxu2 %v1853_v17 }
 0x1b1   :  { %v2472_v24 = vpop.xlane.xlu2 %991  ;;  %1153 = vmatpush.msrb.mxu2 %v1873_v27  ;;  %v2530_v27 = vld [vmem:[%s2704_s7 + $0x8] sm:$0xff]  ;;  %s2557_s7 = sld [smem:[#allocation2 + $0x1]] }
 0x1b2   :  { %729 = vmatpush.msra.mxu1 %v2530_v27 }
 0x1b3   :  { %1154 = vmatpush.msrb.mxu2 %v1895_v35  ;;  %v2819_v35 = vld [vmem:[#allocation8_spill] sm:$0xff] }
 0x1b4   :  { %1175 = vmatpush.msrb.mxu3 %v2819_v35  ;;  %1124 = vmatpush.msrb.mxu1 %v2821_v42  ;;  %v2844_v35 = vld [vmem:[#allocation35_spill] sm:$0xff] }
 0x1b5   :  { %1155 = vmatpush.msrb.mxu2 %v1910_v19 }
 0x1b6   :  { %1176 = vmatpush.msrb.mxu3 %v2823_v49  ;;  %1125 = vmatpush.msrb.mxu1 %v2825_v40  ;;  %v2848_v40 = vld [vmem:[#allocation39_spill] sm:$0xff] }
 0x1b7   :  { %1156 = vmatpush.msrb.mxu2 %v2822_v12 }
 0x1b8   :  { %1177 = vmatpush.msrb.mxu3 %v2827_v57  ;;  %1126 = vmatpush.msrb.mxu1 %v2829_v53  ;;  %v2851_v53 = vld [vmem:[#allocation42_spill] sm:$0xff] }
 0x1b9   :  { %v2489_v44 = vpop.xlane.xlu2 %1005  ;;  %1157 = vmatpush.msrb.mxu2 %v2826_v16 }
 0x1ba   :  { %1178 = vmatpush.msrb.mxu3 %v2831_v2  ;;  %1127 = vmatpush.msrb.mxu1 %v2833_v0  ;;  %v2853_v2 = vld [vmem:[#allocation43_spill] sm:$0xff] }
 0x1bb   :  { %1158 = vmatpush.msrb.mxu2 %v2830_v33 }
 0x1bc   :  { %1179 = vmatpush.msrb.mxu3 %v2835_v10  ;;  %1128 = vmatpush.msrb.mxu1 %v2837_v6 }
 0x1bd   :  { %1159 = vmatpush.msrb.mxu2 %v2834_v30  ;;  %v738_v30 = vstv %s2574_s13 }
 0x1be   :  { %v2476_v26 = vpop.xlane.xlu1 %998 }
 0x1c0   :  { %v1001_v37 = vpop.permute.xlu0 %1000 }
 0x1c1   :  { %v1003_v3 = vmax.f32 %v996_v52, %v1001_v37  ;;  %v1008_v62 = vpop.permute.xlu2 %1007  ;;  %v2836_v37 = vld [vmem:[#allocation25_spill] sm:$0xff]  ;;  %v2838_v52 = vld [vmem:[#allocation27_spill] sm:$0xff] }
 0x1c2   :  { %1108 = vmatpush.msrb.mxu0 %v2836_v37 }
 0x1c3   :  { %v1010_v17 = vmax.f32 %v1003_v3, %v1008_v62  ;;  %v2841_v3 = vld [vmem:[#allocation30_spill] sm:$0xff]  ;;  %v2842_v62 = vld [vmem:[#allocation33_spill] sm:$0xff] }
 0x1c4   :  { %1109 = vmatpush.msrb.mxu0 %v2838_v52  ;;  %v2859_v52 = vld [vmem:[#allocation48_spill] sm:$0xff] }
 0x1c6   :  { %v2493_v51 = vpop.xlane.xlu1 %1012 }
 0x1c8   :  { %v1015_v55 = vpop.permute.xlu0 %1014 }
 0x1c9   :  { %v1017_v36 = vmax.f32 %v1010_v17, %v1015_v55  ;;  %v1029_v19 = vpop.permute.xlu2 %1028 }
 0x1cc   :  { %v663_v58 = vpop.f32.mrf.mxu3 }
 0x1cd   :  { %v664_v4 = vadd.f32 %v663_v58, %v640_v54  ;;  %v2839_v54 = vld [vmem:[#allocation28_spill] sm:$0xff]  ;;  %v2840_v58 = vld [vmem:[#allocation29_spill] sm:$0xff] }
 0x1ce   :  { %v2504_v8 = vpop.xlane.xlu1 %1019  ;;  %1129 = vmatpush.msrb.mxu1 %v2839_v54  ;;  %1110 = vmatpush.msrb.mxu0 %v2840_v58 }
 0x1cf   :  { %v667_v14 = vadd.f32 %v666_v59, %v664_v4  ;;  %v574_v4 = vpop.f32.mrf.mxu0 }
 0x1d0   :  { %v1022_v39 = vpop.permute.xlu0 %1021  ;;  %1130 = vmatpush.msrb.mxu1 %v2841_v3  ;;  %1111 = vmatpush.msrb.mxu0 %v2842_v62  ;;  %v2861_v3 = vld [vmem:[#allocation49_spill] sm:$0xff]  ;;  %v2863_v62 = vld [vmem:[#allocation52_spill] sm:$0xff] }
 0x1d1   :  { %v668_v28 = vsub.f32 0.0, %v667_v14  ;;  %v1024_v18 = vmax.f32 %v1017_v36, %v1022_v39  ;;  %v2843_v14 = vld [vmem:[#allocation34_spill] sm:$0xff]  ;;  %v2845_v36 = vld [vmem:[#allocation36_spill] sm:$0xff]  ;;  %v2846_v39 = vld [vmem:[#allocation37_spill] sm:$0xff] }
 0x1d2   :  { %1131 = vmatpush.msrb.mxu1 %v2843_v14  ;;  %1112 = vmatpush.msrb.mxu0 %v2844_v35  ;;  %v2864_v14 = vld [vmem:[#allocation51_spill] sm:$0xff]  ;;  %v2866_v35 = vld [vmem:[#allocation54_spill] sm:$0xff] }
 0x1d3   :  { %v669_v46 = vmul.f32 1.442695, %v668_v28  ;;  %v1031_v5 = vmax.f32 %v1024_v18, %v1029_v19  ;;  %v600_v28 = vstv %s2557_s7  ;;  %v2847_v18 = vld [vmem:[#allocation38_spill] sm:$0xff]  ;;  %v2849_v19 = vld [vmem:[#allocation40_spill] sm:$0xff] }
 0x1d4   :  { %1132 = vmatpush.msrb.mxu1 %v2845_v36  ;;  %1113 = vmatpush.msrb.mxu0 %v2846_v39 }
 0x1d5   :  { %1491 = vpow2.f32 %v669_v46  ;;  %v1035_v61 = vmax.f32 %v1031_v5, %v2218_v60 }
 0x1d6   :  { %v2543_v32 = vpop.xlane.xlu1 %1026  ;;  %1133 = vmatpush.msrb.mxu1 %v2847_v18  ;;  %1114 = vmatpush.msrb.mxu0 %v2848_v40 }
 0x1d7   :  { %v1043_v21 = vmax.f32 %v1035_v61, %v1485_v22  ;;  %v1089_v61 = vsel %vm2852_vm6, %v2468_v23, %v2472_v24  ;;  %vm2869_vm6 = vcmask 48128  }
 0x1d8   :  { %1134 = vmatpush.msrb.mxu1 %v2849_v19  ;;  %1115 = vmatpush.msrb.mxu0 %v2850_v47  ;;  %v1090_v37 = vsel %vm2857_vm2, %v1089_v61, %v2476_v26 }
 0x1d9   :  { %v2561_v43 = vmax.f32 %v1043_v21, %v1490_v7  ;;  %v2855_v21 = vld [vmem:[#allocation45_spill] sm:$0xff]  ;;  %v1091_v54 = vsel %vm2860_vm3, %v1090_v37, %v2489_v44 }
 0x1da   :  { %1135 = vmatpush.msrb.mxu1 %v2851_v53  ;;  %1116 = vmatpush.msrb.mxu0 %v2853_v2  ;;  %v2867_v44 = vld [vmem:[#allocation53_spill] sm:$0xff] }
 0x1db   :  { %v1492_v48 = vpop.eup %1491 }
 0x1dc   :  { %v671_v38 = vadd.f32 1.0, %v1492_v48  ;;  %1136 = vmatpush.msrb.mxu1 %v2854_v15  ;;  %1117 = vmatpush.msrb.mxu0 %v2855_v21  ;;  %v2856_v48 = vld [vmem:[#allocation46_spill] sm:$0xff] }
 0x1de   :  { %1493 = vrcp.f32 %v671_v38  ;;  %v2565_v55 = vpop.xlane.xlu1 %1037  ;;  %v683_v5 = vand.u32 2147483648, %v671_v38  ;;  %v681_v57 = vand.u32 2147483647, %v671_v38  ;;  %vm677_vm5 = vweird.f32 %v671_v38  ;;  %1137 = vmatpush.msrb.mxu1 %v2856_v48 }
 0x1e0   :  { %v684_v0 = vor.u32 1.1754944e-38, %v683_v5  ;;  %vm682_vm8 = vcmp.eq.f32.partialorder %v681_v57, 8.507059e+37  ;;  %1138 = vmatpush.msrb.mxu1 %v2859_v52  ;;  %v2872_v52 = vld [vmem:[#allocation32_spill] sm:$0xff] }
 0x1e3   :  { %v597_v17 = vpop.f32.mrf.mxu1 }
 0x1e4   :  { %v1494_v46 = vpop.eup %1493  ;;  %v598_v50 = vadd.f32 %v597_v17, %v574_v4  ;;  %v2862_v4 = vld [vmem:[#allocation50_spill] sm:$0xff] }
 0x1e5   :  { %v673_v42 = vmul.f32 %v1494_v46, %v671_v38  ;;  %vm678_vm4 = vweird.f32 %v1494_v46  ;;  %v2858_v38 = vld [vmem:[#allocation47_spill] sm:$0xff]  ;;  %1139 = vmatpush.msrb.mxu1 %v2862_v4 }
 0x1e6   :  { %v601_v12 = vadd.f32 %v600_v28, %v598_v50  ;;  %v2580_v49 = vpop.xlane.xlu1 %1052  ;;  %vm679_vm7 = vmor %vm677_vm5, %vm678_vm4  ;;  %1118 = vmatpush.msrb.mxu0 %v2858_v38  ;;  %vm2865_vm4 = vcmask 31744   ;;  %vm2868_vm5 = vcmask 39936  }
 0x1e7   :  { %v674_v45 = vsub.f32 1.0, %v673_v42  ;;  %v1092_v17 = vsel %vm2865_vm4, %v1091_v54, %v2493_v51 }
 0x1e8   :  { %v602_v22 = vsub.f32 0.0, %v601_v12  ;;  %1119 = vmatpush.msrb.mxu0 %v2861_v3 }
 0x1e9   :  { %v675_v16 = vmul.f32 %v1494_v46, %v674_v45 }
 0x1ea   :  { %v603_v7 = vmul.f32 1.442695, %v602_v22 }
 0x1eb   :  { %v676_v33 = vadd.f32 %v1494_v46, %v675_v16 }
 0x1ec   :  { %1495 = vpow2.f32 %v603_v7 }
 0x1ed   :  { %v680_v10 = vsel %vm679_vm7, %v1494_v46, %v676_v33  ;;  %v1093_v46 = vsel %vm2868_vm5, %v1092_v17, %v2504_v8  ;;  %vm2870_vm7 = vcmask 56320  }
 0x1ee   :  { %v685_v6 = vsel %vm682_vm8, %v684_v0, %v680_v10  ;;  %v1060_v23 = vpop.xlane.xlu1 %1059  ;;  %v1094_v50 = vsel %vm2869_vm6, %v1093_v46, %v2543_v32 }
 0x1ef   :  { %v739_v24 = vmul.f32 %v738_v30, %v685_v6 }
 0x1f1   :  { %1449 = vmatmul.msk.f32.vlgmr.msra.gmra.mxu2 %vm197_vm1, %v739_v24  ;;  %1450 = vmatmul.msk.f32.vlgmr.msra.gmra.mxu3 %vm197_vm1, %v739_v24 }
 0x1f2   :  { %v1496_v58 = vpop.eup %1495  ;;  %1283 = vmatpush.msra.mxu3 %v2863_v62  ;;  %1260 = vmatpush.msra.mxu2 %v2864_v14 }
 0x1f3   :  { %v605_v26 = vadd.f32 1.0, %v1496_v58 }
 0x1f4   :  { %1284 = vmatpush.msra.mxu3 %v2866_v35  ;;  %1261 = vmatpush.msra.mxu2 %v2867_v44 }
 0x1f5   :  { %1497 = vrcp.f32 %v605_v26  ;;  %v617_v45 = vand.u32 2147483648, %v605_v26  ;;  %vm611_vm2 = vweird.f32 %v605_v26 }
 0x1f6   :  { %v1067_v36 = vpop.xlane.xlu1 %1066 }
 0x1f7   :  { %v618_v22 = vor.u32 1.1754944e-38, %v617_v45 }
 0x1f9   :  { %1160 = vmatmul.f32.vlgmr.msrb.gmra.mxu2 %v2223_v29  ;;  %1180 = vmatmul.f32.vlgmr.msrb.gmra.mxu3 %v2218_v60 }
 0x1fa   :  { %1376 = vmatpush.msrb.mxu2 %v2447_v31  ;;  %1396 = vmatpush.msrb.mxu3 %v2452_v1  ;;  %v615_v31 = vand.u32 2147483647, %v605_v26 }
 0x1fb   :  { %v1498_v51 = vpop.eup %1497  ;;  %v1034_v39 = vpop.xlane.xlu0 %1033 }
 0x1fc   :  { %v607_v42 = vmul.f32 %v1498_v51, %v605_v26  ;;  %1377 = vmatpush.msrb.mxu2 %v2459_v41  ;;  %1397 = vmatpush.msrb.mxu3 %v2464_v25  ;;  %v1095_v8 = vsel %vm2870_vm7, %v1094_v50, %v1034_v39  ;;  %vm612_vm8 = vweird.f32 %v1498_v51  ;;  %v689_v41 = vstv %s2620_s14 }
 0x1fd   :  { %v1096_v1 = vsel %vm458_vm13, %v1095_v8, %v2565_v55  ;;  %vm613_vm3 = vmor %vm611_vm2, %vm612_vm8  ;;  %vm616_vm4 = vcmp.eq.f32.partialorder %v615_v31, 8.507059e+37 }
 0x1fe   :  { %v608_v18 = vsub.f32 1.0, %v607_v42  ;;  %v1074_v12 = vpop.xlane.xlu1 %1073 }
 0x200   :  { %v609_v32 = vmul.f32 %v1498_v51, %v608_v18 }
 0x202   :  { %v610_v40 = vadd.f32 %v1498_v51, %v609_v32  ;;  %v1046_v19 = vpop.xlane.xlu2 %1045 }
 0x203   :  { %v1097_v25 = vsel %vm460_vm14, %v1096_v1, %v1046_v19  ;;  %v1081_v7 = vpop.xlane.xlu0 %1080 }
 0x204   :  { %v614_v5 = vsel %vm613_vm3, %v1498_v51, %v610_v40  ;;  %v1098_v16 = vsel %vm462_vm12, %v1097_v25, %v2580_v49 }
 0x205   :  { %v619_v57 = vsel %vm616_vm4, %v618_v22, %v614_v5  ;;  %v1099_v47 = vsel %vm464_vm15, %v1098_v16, %v1060_v23 }
 0x206   :  { %v690_v53 = vmul.f32 %v689_v41, %v619_v57  ;;  %v1100_v55 = vsel %vm466_vm10, %v1099_v47, %v1067_v36  ;;  %v1088_v33 = vpop.xlane.xlu1 %1087  ;;  %v2654_v47 = vstv %s1430_s23 }
 0x207   :  { %v1101_v61 = vsel %vm468_vm11, %v1100_v55, %v1074_v12 }
 0x208   :  { %1447 = vmatmul.msk.f32.vlgmr.msra.gmra.mxu0 %vm197_vm1, %v690_v53  ;;  %1448 = vmatmul.msk.f32.vlgmr.msra.gmra.mxu1 %vm197_vm1, %v690_v53  ;;  %v1102_v2 = vsel %vm470_vm9, %v1101_v61, %v1081_v7 }
 0x209   :  { %v1103_v15 = vsel %vm472_vm0, %v1102_v2, %v1088_v33 }
 0x20a   :  { %1466 = vmatmul.msk.f32.vlgmr.msra.gmra.mxu3 %vm197_vm1, %v1103_v15  ;;  %v1062_v0 = vpop.permute.xlu2 %1061 }
 0x210   :  { %1120 = vmatmul.f32.vlgmr.msrb.gmra.mxu0 %v2223_v29  ;;  %1140 = vmatmul.f32.vlgmr.msrb.gmra.mxu1 %v2218_v60  ;;  %v2648_v29 = vstv %s127_s22  ;;  %v2871_v60 = vld [vmem:[#allocation31_spill] sm:$0xff] }
 0x211   :  { %v293_v54 = vadd.f32 %v2648_v29, %v2872_v52 }
 0x212   :  { %v1083_v23 = vpop.permute.xlu2 %1082 }
 0x213   :  { %v295_v3 = vsub.f32 0.0, %v293_v54 }
 0x215   :  { %v298_v26 = vmul.f32 1.442695, %v295_v3 }
 0x216   :  { %v1055_v49 = vpop.permute.xlu0 %1054 }
 0x217   :  { %v1057_v10 = vmax.f32 %v2561_v43, %v1055_v49  ;;  %v292_v43 = vadd.f32 %v2648_v29, %v2871_v60 }
 0x219   :  { %v1064_v21 = vmax.f32 %v1057_v10, %v1062_v0  ;;  %v294_v58 = vsub.f32 0.0, %v292_v43 }
 0x21b   :  { %v296_v4 = vmul.f32 1.442695, %v294_v58 }
 0x21d   :  { %1499 = vpow2.f32 %v296_v4 }
 0x21e   :  { %v1069_v48 = vpop.permute.xlu1 %1068  ;;  %v1076_v37 = vpop.permute.xlu0 %1075  ;;  %1501 = vpow2.f32 %v298_v26 }
 0x21f   :  { %v1071_v6 = vmax.f32 %v1064_v21, %v1069_v48  ;;  %v1523_v48 = vld [vmem:[%s2698_s1] sm:$0xff] }
 0x221   :  { %v1078_v24 = vmax.f32 %v1071_v6, %v1076_v37  ;;  %v1524_v6 = vld [vmem:[%s2698_s1 + $0x8] sm:$0xff] }
 0x223   :  { %v1085_v38 = vmax.f32 %v1078_v24, %v1083_v23 }
 0x225   :  { %1219 = vmatpush.msra.mxu1 %v1085_v38 }
 0x226   :  { %1464 = vmatmul.msk.f32.vlgmr.msra.gmra.mxu1 %vm458_vm13, %v2362_v11  ;;  %v1500_v11 = vpop.eup %1499 }
 0x227   :  { %1348 = vmatpush.msrb.mxu1 %v2514_v13  ;;  %v1502_v62 = vpop.eup %1501  ;;  %v300_v13 = vadd.f32 1.0, %v1500_v11 }
 0x228   :  { %v301_v14 = vadd.f32 1.0, %v1502_v62 }
 0x229   :  { %1349 = vmatpush.msrb.mxu1 %v2530_v27  ;;  %1503 = vrcp.f32 %v300_v13  ;;  %vm307_vm10 = vweird.f32 %v300_v13  ;;  %v313_v12 = vand.u32 2147483648, %v300_v13  ;;  %v311_v32 = vand.u32 2147483647, %v300_v13 }
 0x22a   :  { %1505 = vrcp.f32 %v301_v14  ;;  %v327_v45 = vand.u32 2147483648, %v301_v14  ;;  %vm321_vm12 = vweird.f32 %v301_v14  ;;  %v325_v31 = vand.u32 2147483647, %v301_v14 }
 0x22b   :  { %v314_v19 = vor.u32 1.1754944e-38, %v313_v12  ;;  %vm312_vm15 = vcmp.eq.f32.partialorder %v311_v32, 8.507059e+37 }
 0x22c   :  { %v328_v22 = vor.u32 1.1754944e-38, %v327_v45  ;;  %vm326_vm5 = vcmp.eq.f32.partialorder %v325_v31, 8.507059e+37 }
 0x22f   :  { %v1504_v27 = vpop.eup %1503 }
 0x230   :  { %v1506_v17 = vpop.eup %1505  ;;  %v303_v35 = vmul.f32 %v1504_v27, %v300_v13  ;;  %vm308_vm0 = vweird.f32 %v1504_v27 }
 0x231   :  { %v317_v44 = vmul.f32 %v1506_v17, %v301_v14  ;;  %vm322_vm9 = vweird.f32 %v1506_v17  ;;  %vm309_vm11 = vmor %vm307_vm10, %vm308_vm0 }
 0x232   :  { %v304_v36 = vsub.f32 1.0, %v303_v35  ;;  %vm323_vm14 = vmor %vm321_vm12, %vm322_vm9 }
 0x233   :  { %v318_v46 = vsub.f32 1.0, %v317_v44 }
 0x234   :  { %v305_v50 = vmul.f32 %v1504_v27, %v304_v36 }
 0x235   :  { %v319_v51 = vmul.f32 %v1506_v17, %v318_v46 }
 0x236   :  { %v306_v8 = vadd.f32 %v1504_v27, %v305_v50 }
 0x237   :  { %v320_v18 = vadd.f32 %v1506_v17, %v319_v51 }
 0x238   :  { %v310_v1 = vsel %vm309_vm11, %v1504_v27, %v306_v8 }
 0x239   :  { %v324_v40 = vsel %vm323_vm14, %v1506_v17, %v320_v18  ;;  %v315_v57 = vsel %vm312_vm15, %v314_v19, %v310_v1 }
 0x23a   :  { %v329_v53 = vsel %vm326_vm5, %v328_v22, %v324_v40  ;;  %v687_v55 = vmul.f32 %v2654_v47, %v315_v57 }
 0x23b   :  { %v688_v7 = vmul.f32 %v2654_v47, %v329_v53 }
 0x23c   :  { %v734_v61 = vperm.slane %v687_v55, 0 }
 0x23d   :  { %v735_v33 = vperm.slane %v688_v7, 0 }
 0x274   :  { %v760_v42 = vpop.f32.mrf.mxu2  ;;  %v780_v39 = vpop.f32.mrf.mxu3 }
 0x27c   :  { %v1161_v25 = vpop.f32.mrf.mxu2  ;;  %v1181_v5 = vpop.f32.mrf.mxu3 }
 0x27d   :  { %v1182_v16 = vadd.f32 %v1181_v5, %v1161_v25  ;;  %v944_v5 = vadd.f32 %v2430_v63, %v2648_v29 }
 0x27f   :  { %1465 = vmatmul.msk.f32.vlgmr.msra.gmra.mxu2 %vm197_vm1, %v1182_v16  ;;  %v945_v16 = vadd.f32 %v2432_v34, %v2648_v29  ;;  %v946_v57 = vsub.f32 0.0, %v944_v5 }
 0x281   :  { %v947_v53 = vsub.f32 0.0, %v945_v16  ;;  %v948_v55 = vmul.f32 1.442695, %v946_v57 }
 0x283   :  { %v950_v7 = vmul.f32 1.442695, %v947_v53 }
 0x285   :  { %v711_v2 = vpop.f32.mrf.mxu0  ;;  %v731_v15 = vpop.f32.mrf.mxu1 }
 0x286   :  { %v736_v49 = vadd.f32 %v734_v61, %v711_v2  ;;  %v737_v0 = vadd.f32 %v735_v33, %v731_v15 }
 0x288   :  { %v783_v10 = vadd.f32 %v760_v42, %v736_v49  ;;  %v784_v21 = vadd.f32 %v780_v39, %v737_v0 }
 0x28a   :  { %v785_v37 = vmul.f32 %v1523_v48, %v783_v10  ;;  %v786_v23 = vmul.f32 %v1524_v6, %v784_v21 }
 0x28c   :  { %787 = vst [vmem:[#allocation5] sm:$0xff] %v785_v37 }
 0x28d   :  { %788 = vst [vmem:[#allocation5 + $0x8] sm:$0xff] %v786_v23  ;;  %v1121_v24 = vpop.f32.mrf.mxu0  ;;  %v1141_v38 = vpop.f32.mrf.mxu1 }
 0x28e   :  { %v1142_v60 = vadd.f32 %v1141_v38, %v1121_v24  ;;  %v1286_v43 = vpop.f32.mrf.mxu3 }
 0x290   :  { %1199 = vmatpush.msra.mxu0 %v1142_v60 }
 0x291   :  { %1463 = vmatmul.msk.f32.vlgmr.msra.gmra.mxu0 %vm458_vm13, %v2334_v56 }
 0x292   :  { %1328 = vmatpush.msrb.mxu0 %v2509_v9 }
 0x294   :  { %1329 = vmatpush.msrb.mxu0 %v2525_v20 }
 0x2a3   :  { %v1221_v26 = vpop.f32.mrf.mxu1 }
 0x302   :  { %v1263_v52 = vpop.f32.mrf.mxu2 }
 0x303   :  { %v1287_v54 = vadd.f32 %v1286_v43, %v1263_v52 }
 0x305   :  { %v1289_v58 = vadd.f32 %v1287_v54, %v666_v59 }
 0x307   :  { %v1290_v3 = vsub.f32 0.0, %v1289_v58 }
 0x309   :  { %v1291_v4 = vmul.f32 1.442695, %v1290_v3 }
 0x30b   :  { %1507 = vpow2.f32 %v1291_v4 }
 0x30e   :  { %v1201_v11 = vpop.f32.mrf.mxu0 }
 0x30f   :  { %v1222_v62 = vadd.f32 %v1221_v26, %v1201_v11 }
 0x311   :  { %v1508_v13 = vpop.eup %1507  ;;  %v1224_v14 = vadd.f32 %v1222_v62, %v600_v28 }
 0x312   :  { %v1293_v27 = vadd.f32 1.0, %v1508_v13 }
 0x313   :  { %v1225_v56 = vsub.f32 0.0, %v1224_v14 }
 0x314   :  { %1509 = vrcp.f32 %v1293_v27  ;;  %v1305_v36 = vand.u32 2147483648, %v1293_v27  ;;  %v1303_v50 = vand.u32 2147483647, %v1293_v27  ;;  %vm1299_vm6 = vweird.f32 %v1293_v27 }
 0x315   :  { %v1226_v9 = vmul.f32 1.442695, %v1225_v56 }
 0x316   :  { %v1306_v28 = vor.u32 1.1754944e-38, %v1305_v36  ;;  %vm1304_vm8 = vcmp.eq.f32.partialorder %v1303_v50, 8.507059e+37 }
 0x317   :  { %1511 = vpow2.f32 %v1226_v9 }
 0x31a   :  { %v1510_v20 = vpop.eup %1509 }
 0x31b   :  { %v1295_v17 = vmul.f32 %v1510_v20, %v1293_v27  ;;  %vm1300_vm13 = vweird.f32 %v1510_v20 }
 0x31c   :  { %vm1301_vm7 = vmor %vm1299_vm6, %vm1300_vm13 }
 0x31d   :  { %v1512_v35 = vpop.eup %1511  ;;  %v1296_v44 = vsub.f32 1.0, %v1295_v17 }
 0x31e   :  { %v1228_v59 = vadd.f32 1.0, %v1512_v35 }
 0x31f   :  { %v1297_v46 = vmul.f32 %v1510_v20, %v1296_v44 }
 0x320   :  { %1513 = vrcp.f32 %v1228_v59  ;;  %v1240_v32 = vand.u32 2147483648, %v1228_v59  ;;  %v1238_v1 = vand.u32 2147483647, %v1228_v59  ;;  %vm1234_vm3 = vweird.f32 %v1228_v59 }
 0x321   :  { %v1298_v51 = vadd.f32 %v1510_v20, %v1297_v46  ;;  %1515 = vpow2.f32 %v948_v55 }
 0x322   :  { %v1241_v19 = vor.u32 1.1754944e-38, %v1240_v32  ;;  %vm1239_vm0 = vcmp.eq.f32.partialorder %v1238_v1, 8.507059e+37  ;;  %1517 = vpow2.f32 %v950_v7 }
 0x323   :  { %v1302_v42 = vsel %vm1301_vm7, %v1510_v20, %v1298_v51 }
 0x324   :  { %v1307_v39 = vsel %vm1304_vm8, %v1306_v28, %v1302_v42 }
 0x325   :  { %v1358_v8 = vmul.f32 %v1307_v39, %v738_v30 }
 0x326   :  { %v1514_v18 = vpop.eup %1513 }
 0x327   :  { %v1230_v12 = vmul.f32 %v1514_v18, %v1228_v59  ;;  %1469 = vmatmul.msk.f32.vlgmr.msrb.gmra.mxu2 %vm197_vm1, %v1358_v8  ;;  %1470 = vmatmul.msk.f32.vlgmr.msrb.gmra.mxu3 %vm197_vm1, %v1358_v8  ;;  %vm1235_vm2 = vweird.f32 %v1514_v18  ;;  %v1516_v61 = vpop.eup %1515  ;;  %v1526_v59 = vld [vmem:[%s2698_s1 + $0x18] sm:$0xff] }
 0x328   :  { %vm1236_vm4 = vmor %vm1234_vm3, %vm1235_vm2  ;;  %v1518_v33 = vpop.eup %1517  ;;  %v952_v2 = vadd.f32 1.0, %v1516_v61 }
 0x329   :  { %v1231_v45 = vsub.f32 1.0, %v1230_v12 }
 0x32a   :  { %1519 = vrcp.f32 %v952_v2  ;;  %v965_v29 = vand.u32 2147483648, %v952_v2  ;;  %v963_v23 = vand.u32 2147483647, %v952_v2 }
 0x32b   :  { %v1232_v31 = vmul.f32 %v1514_v18, %v1231_v45 }
 0x32c   :  { %v966_v60 = vor.u32 1.1754944e-38, %v965_v29  ;;  %vm964_vm15 = vcmp.eq.f32.partialorder %v963_v23, 8.507059e+37 }
 0x32d   :  { %v1233_v40 = vadd.f32 %v1514_v18, %v1232_v31 }
 0x32f   :  { %v1237_v22 = vsel %vm1236_vm4, %v1514_v18, %v1233_v40 }
 0x330   :  { %v1242_v25 = vsel %vm1239_vm0, %v1241_v19, %v1237_v22  ;;  %v1520_v15 = vpop.eup %1519 }
 0x331   :  { %v1310_v30 = vmul.f32 %v1242_v25, %v689_v41  ;;  %v953_v41 = vadd.f32 1.0, %v1518_v33  ;;  %v955_v0 = vmul.f32 %v1520_v15, %v952_v2  ;;  %vm960_vm9 = vweird.f32 %v1520_v15 }
 0x333   :  { %1467 = vmatmul.msk.f32.vlgmr.msrb.gmra.mxu0 %vm197_vm1, %v1310_v30  ;;  %1468 = vmatmul.msk.f32.vlgmr.msrb.gmra.mxu1 %vm197_vm1, %v1310_v30  ;;  %1521 = vrcp.f32 %v953_v41  ;;  %v956_v63 = vsub.f32 1.0, %v955_v0  ;;  %vm959_vm1 = vweird.f32 %v952_v2  ;;  %vm973_vm10 = vweird.f32 %v953_v41 }
 0x334   :  { %v979_v37 = vand.u32 2147483648, %v953_v41  ;;  %vm961_vm12 = vmor %vm959_vm1, %vm960_vm9  ;;  %v977_v38 = vand.u32 2147483647, %v953_v41 }
 0x335   :  { %v957_v48 = vmul.f32 %v1520_v15, %v956_v63 }
 0x336   :  { %v980_v43 = vor.u32 1.1754944e-38, %v979_v37  ;;  %vm978_vm5 = vcmp.eq.f32.partialorder %v977_v38, 8.507059e+37 }
 0x337   :  { %v958_v6 = vadd.f32 %v1520_v15, %v957_v48 }
 0x339   :  { %v1522_v49 = vpop.eup %1521  ;;  %v962_v52 = vsel %vm961_vm12, %v1520_v15, %v958_v6 }
 0x33a   :  { %v969_v10 = vmul.f32 %v1522_v49, %v953_v41  ;;  %vm974_vm11 = vweird.f32 %v1522_v49  ;;  %v967_v58 = vsel %vm964_vm15, %v966_v60, %v962_v52 }
 0x33b   :  { %vm975_vm14 = vmor %vm973_vm10, %vm974_vm11  ;;  %v1308_v4 = vmul.f32 %v967_v58, %v2654_v47 }
 0x33c   :  { %v970_v21 = vsub.f32 1.0, %v969_v10 }
 0x33d   :  { %v1354_v11 = vperm.slane %v1308_v4, 0 }
 0x33e   :  { %v971_v34 = vmul.f32 %v1522_v49, %v970_v21 }
 0x340   :  { %v972_v24 = vadd.f32 %v1522_v49, %v971_v34 }
 0x342   :  { %v976_v54 = vsel %vm975_vm14, %v1522_v49, %v972_v24 }
 0x343   :  { %v981_v3 = vsel %vm978_vm5, %v980_v43, %v976_v54 }
 0x344   :  { %v1309_v26 = vmul.f32 %v981_v3, %v2654_v47  ;;  %v1525_v47 = vld [vmem:[%s2698_s1 + $0x10] sm:$0xff] }
 0x346   :  { %v1355_v62 = vperm.slane %v1309_v26, 0 }
 0x3aa   :  { %v1379_v9 = vpop.f32.mrf.mxu2  ;;  %v1399_v20 = vpop.f32.mrf.mxu3 }
 0x3b0   :  { %v1331_v13 = vpop.f32.mrf.mxu0  ;;  %v1351_v14 = vpop.f32.mrf.mxu1 }
 0x3b1   :  { %v1356_v27 = vadd.f32 %v1354_v11, %v1331_v13  ;;  %v1357_v56 = vadd.f32 %v1355_v62, %v1351_v14 }
 0x3b3   :  { %v1402_v17 = vadd.f32 %v1379_v9, %v1356_v27  ;;  %v1403_v35 = vadd.f32 %v1399_v20, %v1357_v56 }
 0x3b5   :  { %v1404_v44 = vmul.f32 %v1525_v47, %v1402_v17  ;;  %v1405_v36 = vmul.f32 %v1526_v59, %v1403_v35 }
 0x3b7   :  { %1407 = vst [vmem:[#allocation5 + $0x10] sm:$0xff] %v1404_v44 }
 0x3b8   :  { %1408 = vst [vmem:[#allocation5 + $0x18] sm:$0xff] %v1405_v36 }
 0x3b9   :  { %1421 = dma.vmem_to_hbm [thread:$0]  %s1414_s19, 512, %s1416_s30, [#allocation3], %s1576_s8, %s1576_s8, %s1569_s21  }
 0x3ba   :  { %1565 = dma.done.wait [#allocation3], 512  }
 0x3bb   :  { %1566 = vsyncadd [#allocation3], 4294966784 }
 0x3bc   :  { %1426 = vsyncpa [#allocation3], 1 }
 0x3bd   :  { %1427 = vsyncpa [#allocation4], 1 }

</bundles_post_ra>
